<compile_context>
chip_gen: v7x
topology: tpu7x:2x2x1
jax: 0.10.0
libtpu: 0.0.40
codegen_flags: <defaults>
</compile_context>

<pallas_src>
import jax
import jax.numpy as jnp
from jax.experimental import pallas as pl
from jax.experimental.pallas import tpu as pltpu


def _relu6(x):
    return jnp.minimum(jnp.maximum(x, 0.0), 6.0)


# ---------------------------------------------------------------------------
# Conv GEMM kernel: (C_out, M_blk) = (C_out, K) @ (K, M_blk) + b, then ReLU6.
# ---------------------------------------------------------------------------
def _conv_gemm_relu6_kernel(w_ref, x_ref, b_ref, o_ref):
    acc = jnp.dot(w_ref[...], x_ref[...], preferred_element_type=jnp.float32)
    acc = acc + b_ref[...]                      # (C_out, 1) broadcast over lanes
    o_ref[...] = _relu6(acc).astype(o_ref.dtype)


def conv_gemm_relu6(w2d, patches, bias, *, m_blocks=1, out_dtype=jnp.bfloat16):
    """out (C_out, M) = relu6(w2d (C_out,K) @ patches (K,M) + bias)."""
    c_out, k = w2d.shape
    k2, m = patches.shape
    assert k == k2
    # Lane (last) dim of each block must be a multiple of 128 or the full M.
    if m_blocks > 1 and (m % m_blocks or (m // m_blocks) % 128):
        m_blocks = 1
    mb = m // m_blocks
    w2d = w2d.astype(jnp.bfloat16)
    patches = patches.astype(jnp.bfloat16)       # no-op: patches already bf16
    bias2d = bias.astype(jnp.float32).reshape(c_out, 1)
    return pl.pallas_call(
        _conv_gemm_relu6_kernel,
        out_shape=jax.ShapeDtypeStruct((c_out, m), out_dtype),
        grid_spec=pltpu.PrefetchScalarGridSpec(
            num_scalar_prefetch=0,
            grid=(m_blocks,),
            in_specs=[
                pl.BlockSpec((c_out, k), lambda i: (0, 0)),
                pl.BlockSpec((k, mb), lambda i: (0, i)),
                pl.BlockSpec((c_out, 1), lambda i: (0, 0)),
            ],
            out_specs=pl.BlockSpec((c_out, mb), lambda i: (0, i)),
        ),
        compiler_params=pltpu.CompilerParams(
            dimension_semantics=("parallel",)),
    )(w2d, patches, bias2d)


# ---------------------------------------------------------------------------
# im2col in (C, N, H, W) layout.  K flattened as (kh, kw, c_in); M = (N, Ho, Wo).
# ---------------------------------------------------------------------------
def _im2col_cnhw(a, kh, kw, stride, padding):
    c, n, h, w = a.shape
    if padding:
        a = jnp.pad(a, ((0, 0), (0, 0), (padding, padding), (padding, padding)))
    hp, wp = h + 2 * padding, w + 2 * padding
    ho = (hp - kh) // stride + 1
    wo = (wp - kw) // stride + 1
    cols = [
        a[:, :, i:i + (ho - 1) * stride + 1:stride,
              j:j + (wo - 1) * stride + 1:stride]
        for i in range(kh) for j in range(kw)
    ]
    patches = jnp.stack(cols, axis=0)            # (kh*kw, C, N, Ho, Wo) - no transpose
    return patches.reshape(kh * kw * c, n * ho * wo), (n, ho, wo)


def conv2d_relu6(a, weight, bias, *, stride, padding, m_blocks=1):
    """a: (C_in, N, H, W); weight: PyTorch (C_out, C_in, KH, KW) -> (C_out, N, Ho, Wo)."""
    c_out, c_in, kh, kw = weight.shape
    patches, (n, ho, wo) = _im2col_cnhw(a, kh, kw, stride, padding)
    w2d = weight.transpose(0, 2, 3, 1).reshape(c_out, kh * kw * c_in)  # K=(kh,kw,c_in)
    out2d = conv_gemm_relu6(w2d, patches, bias, m_blocks=m_blocks)
    return out2d.reshape(c_out, n, ho, wo)       # free reshape: next layer's input


# ---------------------------------------------------------------------------
# Fused tail: conv3 + flatten + fc1 + ReLU6 + fc2 in one pallas_call.
# ---------------------------------------------------------------------------
def _tail_kernel(p3_ref, w3_ref, b3_ref, w1_ref, b1_ref, w2_ref, b2_ref, o_ref):
    n_samples = p3_ref.shape[0]
    n_groups = w1_ref.shape[0]                   # = conv3 C_out
    for n in range(n_samples):                   # static unroll (tiny batch)
        # conv3 for sample n: (C3, K3) @ (K3, Ho*Wo) -> (C3, Ho*Wo), bf16 MXU, f32 acc
        c3 = jnp.dot(w3_ref[...], p3_ref[n], preferred_element_type=jnp.float32)
        c3 = _relu6(c3 + b3_ref[...])
        # fc1: PyTorch (C,H,W) flatten folded into the per-channel weight split.
        y = b1_ref[...]                          # (1, 80)
        for g in range(n_groups):
            y = y + jnp.dot(c3[g:g + 1, :], w1_ref[g],
                            preferred_element_type=jnp.float32)
        y = _relu6(y)
        # fc2: (1, 80) -> (1, 1)
        out_n = jnp.sum(y * w2_ref[...], axis=-1, keepdims=True) + b2_ref[...]
        o_ref[n:n + 1, :] = out_n.astype(o_ref.dtype)


def tail_forward(a2, conv3_w, conv3_b, fc1_w, fc1_b, fc2_w, fc2_b):
    """a2: (C_in, N, H, W) conv2 activations (bf16) -> (N, 1) f32."""
    c_out, c_in, kh, kw = conv3_w.shape
    c, n, h, w = a2.shape
    assert c == c_in
    ho, wo = h - kh + 1, w - kw + 1              # conv3: stride 1, padding 0
    hw = ho * wo
    # Per-sample conv3 patches: (N, K3, Ho*Wo) with K3 = (kh, kw, c_in).
    cols = [a2[:, :, i:i + ho, j:j + wo] for i in range(kh) for j in range(kw)]
    p3 = jnp.stack(cols, axis=0)                 # (kh*kw, C, N, Ho, Wo)
    p3 = p3.transpose(2, 0, 1, 3, 4).reshape(n, kh * kw * c_in, hw)
    p3 = p3.astype(jnp.bfloat16)
    w3p = conv3_w.transpose(0, 2, 3, 1).reshape(c_out, kh * kw * c_in)
    w3p = w3p.astype(jnp.bfloat16)
    assert fc1_w.shape[1] == c_out * hw
    # fc1 weight reordered so the flatten needs no in-kernel reshape:
    w1p = fc1_w.reshape(fc1_w.shape[0], c_out, hw).transpose(1, 2, 0)  # (C3, HW, 80)
    return pl.pallas_call(                       # whole-array (no grid) call
        _tail_kernel,
        out_shape=jax.ShapeDtypeStruct((n, 1), jnp.float32),
    )(p3, w3p, conv3_b.astype(jnp.float32).reshape(c_out, 1), w1p,
      fc1_b.reshape(1, -1), fc2_w, fc2_b.reshape(1, 1))


# ---------------------------------------------------------------------------
# Model
# ---------------------------------------------------------------------------
def init_params(key):
    ks = jax.random.split(key, 8)
    return {
        "conv1_w": 0.1 * jax.random.normal(ks[0], (2, 1, 8, 8), jnp.float32),
        "conv1_b": 0.1 * jax.random.normal(ks[1], (2,), jnp.float32),
        "conv2_w": 0.1 * jax.random.normal(ks[2], (2, 2, 6, 6), jnp.float32),
        "conv2_b": 0.1 * jax.random.normal(ks[3], (2,), jnp.float32),
        "conv3_w": 0.1 * jax.random.normal(ks[4], (4, 2, 14, 14), jnp.float32),
        "conv3_b": 0.1 * jax.random.normal(ks[5], (4,), jnp.float32),
        # full head: normal(0, 0.1) weights, zero biases (as in the module __init__)
        "fc1_w": 0.1 * jax.random.normal(ks[6], (80, 4 * 80), jnp.float32),
        "fc1_b": jnp.zeros((80,), jnp.float32),
        "fc2_w": 0.1 * jax.random.normal(ks[7], (1, 80), jnp.float32),
        "fc2_b": jnp.zeros((1,), jnp.float32),
    }


def one_hot_sdiff_forward(params, x):
    """x: (N, 1, H, W) float32 NCHW -> (N, 1) float32."""
    a = x.transpose(1, 0, 2, 3)                  # (C=1, N, H, W); size-1 move, no real copy
    a = a.astype(jnp.bfloat16)                   # cast BEFORE im2col: half-width patches
    a = conv2d_relu6(a, params["conv1_w"], params["conv1_b"],
                     stride=2, padding=1, m_blocks=2)   # 2 parallel blocks (v7x megacore)
    a = conv2d_relu6(a, params["conv2_w"], params["conv2_b"],
                     stride=3, padding=3, m_blocks=1)   # single whole-M block
    return tail_forward(a, params["conv3_w"], params["conv3_b"],
                        params["fc1_w"], params["fc1_b"],
                        params["fc2_w"], params["fc2_b"])


if __name__ == "__main__":
    key = jax.random.PRNGKey(0)
    pkey, xkey = jax.random.split(key)
    params = init_params(pkey)
    # Input spatial size chosen so the conv stack produces (N, 4, 4, 20),
    # i.e. exactly 4*80 = 320 features per sample, as Linear(320, 80) requires:
    #   (100,196) --k8,s2,p1--> (48,96) --k6,s3,p3--> (17,33) --k14,s1,p0--> (4,20)
    x = jax.random.normal(xkey, (2, 1, 100, 196), jnp.float32)
    y = jax.jit(one_hot_sdiff_forward)(params, x)
    y = jax.block_until_ready(y)
    assert y.shape == (2, 1) and y.dtype == jnp.float32
    print("KERNEL_OK")
</pallas_src>

<mosaic_0001>
module attributes {stable_mosaic.version = 11 : i64} {
  func.func @_conv_gemm_relu6_kernel(%arg0: i32, %arg1: memref<2x64xbf16, #tpu.memory_space<vmem>>, %arg2: memref<64x4608xbf16, #tpu.memory_space<vmem>>, %arg3: memref<2x1xf32, #tpu.memory_space<vmem>>, %arg4: memref<2x4608xbf16, #tpu.memory_space<vmem>>) attributes {dimension_semantics = [#tpu.dimension_semantics<parallel>], iteration_bounds = array<i64: 2>, scalar_prefetch = 0 : i64, scratch_operands = 0 : i64, tpu.core_type = #tpu.core_type<tc>, window_params = [{pipeline_mode = #tpu.pipeline_mode<synchronous>, transform_indices = @transform_0, window_bounds = array<i64: 2, 64>}, {transform_indices = @transform_1, window_bounds = array<i64: 64, 4608>}, {pipeline_mode = #tpu.pipeline_mode<synchronous>, transform_indices = @transform_2, window_bounds = array<i64: 2, 1>}, {transform_indices = @transform_3, window_bounds = array<i64: 2, 4608>}]} {
    %c0 = arith.constant 0 : index
    %c0_0 = arith.constant 0 : index
    %0 = vector.load %arg1[%c0, %c0_0] : memref<2x64xbf16, #tpu.memory_space<vmem>>, vector<2x64xbf16>
    %c0_1 = arith.constant 0 : index
    %c0_2 = arith.constant 0 : index
    %1 = vector.load %arg2[%c0_1, %c0_2] : memref<64x4608xbf16, #tpu.memory_space<vmem>>, vector<64x4608xbf16>
    %cst = arith.constant dense<0.000000e+00> : vector<2x4608xf32>
    %2 = tpu.matmul %0, %1, %cst {dimension_numbers = #tpu.dot_dimension_numbers<[1], [0], [0], [1], [0, 0, 1, 1], [], []>} : vector<2x64xbf16>, vector<64x4608xbf16>, vector<2x4608xf32> -> vector<2x4608xf32>
    %c0_3 = arith.constant 0 : index
    %c0_4 = arith.constant 0 : index
    %3 = vector.load %arg3[%c0_3, %c0_4] : memref<2x1xf32, #tpu.memory_space<vmem>>, vector<2x1xf32>
    %4 = vector.broadcast %3 : vector<2x1xf32> to vector<2x4608xf32>
    %5 = arith.addf %2, %4 : vector<2x4608xf32>
    %cst_5 = arith.constant 0.000000e+00 : f32
    %6 = vector.broadcast %cst_5 : f32 to vector<2x4608xf32>
    %7 = arith.maximumf %5, %6 : vector<2x4608xf32>
    %cst_6 = arith.constant 6.000000e+00 : f32
    %8 = vector.broadcast %cst_6 : f32 to vector<2x4608xf32>
    %9 = arith.minimumf %7, %8 : vector<2x4608xf32>
    %10 = arith.truncf %9 : vector<2x4608xf32> to vector<2x4608xbf16>
    %c0_7 = arith.constant 0 : index
    %c0_8 = arith.constant 0 : index
    %11 = vector.load %arg4[%c0_7, %c0_8] : memref<2x4608xbf16, #tpu.memory_space<vmem>>, vector<2x4608xbf16>
    tpu.vector_store %arg4[%c0_7, %c0_8], %10 {strides = array<i32>} : memref<2x4608xbf16, #tpu.memory_space<vmem>>, vector<2x4608xbf16>,
    return
  }
  func.func @transform_0(%arg0: i32) -> (i32, i32) {
    %c0_i32 = arith.constant 0 : i32
    %c0_i32_0 = arith.constant 0 : i32
    %c0_i32_1 = arith.constant 0 : i32
    return %c0_i32, %c0_i32_0 : i32, i32
  }
  func.func @transform_1(%arg0: i32) -> (i32, i32) {
    %c0_i32 = arith.constant 0 : i32
    %c0_i32_0 = arith.constant 0 : i32
    return %c0_i32, %arg0 : i32, i32
  }
  func.func @transform_2(%arg0: i32) -> (i32, i32) {
    %c0_i32 = arith.constant 0 : i32
    %c0_i32_0 = arith.constant 0 : i32
    %c0_i32_1 = arith.constant 0 : i32
    return %c0_i32, %c0_i32_0 : i32, i32
  }
  func.func @transform_3(%arg0: i32) -> (i32, i32) {
    %c0_i32 = arith.constant 0 : i32
    %c0_i32_0 = arith.constant 0 : i32
    return %c0_i32, %arg0 : i32, i32
  }
}

module attributes {stable_mosaic.version = 11 : i64} {
  func.func @_conv_gemm_relu6_kernel(%arg0: i32, %arg1: memref<2x72xbf16, #tpu.memory_space<vmem>>, %arg2: memref<72x1122xbf16, #tpu.memory_space<vmem>>, %arg3: memref<2x1xf32, #tpu.memory_space<vmem>>, %arg4: memref<2x1122xbf16, #tpu.memory_space<vmem>>) attributes {dimension_semantics = [#tpu.dimension_semantics<parallel>], iteration_bounds = array<i64: 1>, scalar_prefetch = 0 : i64, scratch_operands = 0 : i64, tpu.core_type = #tpu.core_type<tc>, window_params = [{pipeline_mode = #tpu.pipeline_mode<synchronous>, transform_indices = @transform_0, window_bounds = array<i64: 2, 72>}, {transform_indices = @transform_1, window_bounds = array<i64: 72, 1122>}, {pipeline_mode = #tpu.pipeline_mode<synchronous>, transform_indices = @transform_2, window_bounds = array<i64: 2, 1>}, {transform_indices = @transform_3, window_bounds = array<i64: 2, 1122>}]} {
    %c0 = arith.constant 0 : index
    %c0_0 = arith.constant 0 : index
    %0 = vector.load %arg1[%c0, %c0_0] : memref<2x72xbf16, #tpu.memory_space<vmem>>, vector<2x72xbf16>
    %c0_1 = arith.constant 0 : index
    %c0_2 = arith.constant 0 : index
    %1 = vector.load %arg2[%c0_1, %c0_2] : memref<72x1122xbf16, #tpu.memory_space<vmem>>, vector<72x1122xbf16>
    %cst = arith.constant dense<0.000000e+00> : vector<2x1122xf32>
    %2 = tpu.matmul %0, %1, %cst {dimension_numbers = #tpu.dot_dimension_numbers<[1], [0], [0], [1], [0, 0, 1, 1], [], []>} : vector<2x72xbf16>, vector<72x1122xbf16>, vector<2x1122xf32> -> vector<2x1122xf32>
    %c0_3 = arith.constant 0 : index
    %c0_4 = arith.constant 0 : index
    %3 = vector.load %arg3[%c0_3, %c0_4] : memref<2x1xf32, #tpu.memory_space<vmem>>, vector<2x1xf32>
    %4 = vector.broadcast %3 : vector<2x1xf32> to vector<2x1122xf32>
    %5 = arith.addf %2, %4 : vector<2x1122xf32>
    %cst_5 = arith.constant 0.000000e+00 : f32
    %6 = vector.broadcast %cst_5 : f32 to vector<2x1122xf32>
    %7 = arith.maximumf %5, %6 : vector<2x1122xf32>
    %cst_6 = arith.constant 6.000000e+00 : f32
    %8 = vector.broadcast %cst_6 : f32 to vector<2x1122xf32>
    %9 = arith.minimumf %7, %8 : vector<2x1122xf32>
    %10 = arith.truncf %9 : vector<2x1122xf32> to vector<2x1122xbf16>
    %c0_7 = arith.constant 0 : index
    %c0_8 = arith.constant 0 : index
    %11 = vector.load %arg4[%c0_7, %c0_8] : memref<2x1122xbf16, #tpu.memory_space<vmem>>, vector<2x1122xbf16>
    tpu.vector_store %arg4[%c0_7, %c0_8], %10 {strides = array<i32>} : memref<2x1122xbf16, #tpu.memory_space<vmem>>, vector<2x1122xbf16>,
    return
  }
  func.func @transform_0(%arg0: i32) -> (i32, i32) {
    %c0_i32 = arith.constant 0 : i32
    %c0_i32_0 = arith.constant 0 : i32
    %c0_i32_1 = arith.constant 0 : i32
    return %c0_i32, %c0_i32_0 : i32, i32
  }
  func.func @transform_1(%arg0: i32) -> (i32, i32) {
    %c0_i32 = arith.constant 0 : i32
    %c0_i32_0 = arith.constant 0 : i32
    return %c0_i32, %arg0 : i32, i32
  }
  func.func @transform_2(%arg0: i32) -> (i32, i32) {
    %c0_i32 = arith.constant 0 : i32
    %c0_i32_0 = arith.constant 0 : i32
    %c0_i32_1 = arith.constant 0 : i32
    return %c0_i32, %c0_i32_0 : i32, i32
  }
  func.func @transform_3(%arg0: i32) -> (i32, i32) {
    %c0_i32 = arith.constant 0 : i32
    %c0_i32_0 = arith.constant 0 : i32
    return %c0_i32, %arg0 : i32, i32
  }
}

module attributes {stable_mosaic.version = 11 : i64} {
  func.func @_tail_kernel(%arg0: memref<2x392x80xbf16, #tpu.memory_space<vmem>>, %arg1: memref<4x392xbf16, #tpu.memory_space<vmem>>, %arg2: memref<4x1xf32, #tpu.memory_space<vmem>>, %arg3: memref<4x80x80xf32, #tpu.memory_space<vmem>>, %arg4: memref<1x80xf32, #tpu.memory_space<vmem>>, %arg5: memref<1x80xf32, #tpu.memory_space<vmem>>, %arg6: memref<1x1xf32, #tpu.memory_space<vmem>>, %arg7: memref<2x1xf32, #tpu.memory_space<vmem>>) attributes {dimension_semantics = [], scalar_prefetch = 0 : i64, scratch_operands = 0 : i64, tpu.core_type = #tpu.core_type<tc>} {
    %c0 = arith.constant 0 : index
    %c0_0 = arith.constant 0 : index
    %0 = vector.load %arg1[%c0, %c0_0] : memref<4x392xbf16, #tpu.memory_space<vmem>>, vector<4x392xbf16>
    %c0_1 = arith.constant 0 : index
    %c0_2 = arith.constant 0 : index
    %c0_3 = arith.constant 0 : index
    %1 = vector.load %arg0[%c0_1, %c0_2, %c0_3] : memref<2x392x80xbf16, #tpu.memory_space<vmem>>, vector<1x392x80xbf16>
    %2 = vector.shape_cast %1 : vector<1x392x80xbf16> to vector<392x80xbf16>
    %cst = arith.constant dense<0.000000e+00> : vector<4x80xf32>
    %3 = tpu.matmul %0, %2, %cst {dimension_numbers = #tpu.dot_dimension_numbers<[1], [0], [0], [1], [0, 0, 1, 1], [], []>} : vector<4x392xbf16>, vector<392x80xbf16>, vector<4x80xf32> -> vector<4x80xf32>
    %c0_4 = arith.constant 0 : index
    %c0_5 = arith.constant 0 : index
    %4 = vector.load %arg2[%c0_4, %c0_5] : memref<4x1xf32, #tpu.memory_space<vmem>>, vector<4x1xf32>
    %5 = vector.broadcast %4 : vector<4x1xf32> to vector<4x80xf32>
    %6 = arith.addf %3, %5 : vector<4x80xf32>
    %cst_6 = arith.constant 0.000000e+00 : f32
    %7 = vector.broadcast %cst_6 : f32 to vector<4x80xf32>
    %8 = arith.maximumf %6, %7 : vector<4x80xf32>
    %cst_7 = arith.constant 6.000000e+00 : f32
    %9 = vector.broadcast %cst_7 : f32 to vector<4x80xf32>
    %10 = arith.minimumf %8, %9 : vector<4x80xf32>
    %c0_8 = arith.constant 0 : index
    %c0_9 = arith.constant 0 : index
    %11 = vector.load %arg4[%c0_8, %c0_9] : memref<1x80xf32, #tpu.memory_space<vmem>>, vector<1x80xf32>
    %12 = vector.extract_strided_slice %10 {offsets = [0, 0], sizes = [1, 80], strides = [1, 1]} : vector<4x80xf32> to vector<1x80xf32>
    %c0_10 = arith.constant 0 : index
    %c0_11 = arith.constant 0 : index
    %c0_12 = arith.constant 0 : index
    %13 = vector.load %arg3[%c0_10, %c0_11, %c0_12] : memref<4x80x80xf32, #tpu.memory_space<vmem>>, vector<1x80x80xf32>
    %14 = vector.shape_cast %13 : vector<1x80x80xf32> to vector<80x80xf32>
    %cst_13 = arith.constant dense<0.000000e+00> : vector<1x80xf32>
    %15 = tpu.matmul %12, %14, %cst_13 {dimension_numbers = #tpu.dot_dimension_numbers<[1], [0], [0], [1], [0, 0, 1, 1], [], []>} : vector<1x80xf32>, vector<80x80xf32>, vector<1x80xf32> -> vector<1x80xf32>
    %16 = arith.addf %11, %15 : vector<1x80xf32>
    %17 = vector.extract_strided_slice %10 {offsets = [1, 0], sizes = [1, 80], strides = [1, 1]} : vector<4x80xf32> to vector<1x80xf32>
    %c1 = arith.constant 1 : index
    %c0_14 = arith.constant 0 : index
    %c0_15 = arith.constant 0 : index
    %18 = vector.load %arg3[%c1, %c0_14, %c0_15] : memref<4x80x80xf32, #tpu.memory_space<vmem>>, vector<1x80x80xf32>
    %19 = vector.shape_cast %18 : vector<1x80x80xf32> to vector<80x80xf32>
    %cst_16 = arith.constant dense<0.000000e+00> : vector<1x80xf32>
    %20 = tpu.matmul %17, %19, %cst_16 {dimension_numbers = #tpu.dot_dimension_numbers<[1], [0], [0], [1], [0, 0, 1, 1], [], []>} : vector<1x80xf32>, vector<80x80xf32>, vector<1x80xf32> -> vector<1x80xf32>
    %21 = arith.addf %16, %20 : vector<1x80xf32>
    %22 = vector.extract_strided_slice %10 {offsets = [2, 0], sizes = [1, 80], strides = [1, 1]} : vector<4x80xf32> to vector<1x80xf32>
    %c2 = arith.constant 2 : index
    %c0_17 = arith.constant 0 : index
    %c0_18 = arith.constant 0 : index
    %23 = vector.load %arg3[%c2, %c0_17, %c0_18] : memref<4x80x80xf32, #tpu.memory_space<vmem>>, vector<1x80x80xf32>
    %24 = vector.shape_cast %23 : vector<1x80x80xf32> to vector<80x80xf32>
    %cst_19 = arith.constant dense<0.000000e+00> : vector<1x80xf32>
    %25 = tpu.matmul %22, %24, %cst_19 {dimension_numbers = #tpu.dot_dimension_numbers<[1], [0], [0], [1], [0, 0, 1, 1], [], []>} : vector<1x80xf32>, vector<80x80xf32>, vector<1x80xf32> -> vector<1x80xf32>
    %26 = arith.addf %21, %25 : vector<1x80xf32>
    %27 = vector.extract_strided_slice %10 {offsets = [3, 0], sizes = [1, 80], strides = [1, 1]} : vector<4x80xf32> to vector<1x80xf32>
    %c3 = arith.constant 3 : index
    %c0_20 = arith.constant 0 : index
    %c0_21 = arith.constant 0 : index
    %28 = vector.load %arg3[%c3, %c0_20, %c0_21] : memref<4x80x80xf32, #tpu.memory_space<vmem>>, vector<1x80x80xf32>
    %29 = vector.shape_cast %28 : vector<1x80x80xf32> to vector<80x80xf32>
    %cst_22 = arith.constant dense<0.000000e+00> : vector<1x80xf32>
    %30 = tpu.matmul %27, %29, %cst_22 {dimension_numbers = #tpu.dot_dimension_numbers<[1], [0], [0], [1], [0, 0, 1, 1], [], []>} : vector<1x80xf32>, vector<80x80xf32>, vector<1x80xf32> -> vector<1x80xf32>
    %31 = arith.addf %26, %30 : vector<1x80xf32>
    %cst_23 = arith.constant 0.000000e+00 : f32
    %32 = vector.broadcast %cst_23 : f32 to vector<1x80xf32>
    %33 = arith.maximumf %31, %32 : vector<1x80xf32>
    %cst_24 = arith.constant 6.000000e+00 : f32
    %34 = vector.broadcast %cst_24 : f32 to vector<1x80xf32>
    %35 = arith.minimumf %33, %34 : vector<1x80xf32>
    %c0_25 = arith.constant 0 : index
    %c0_26 = arith.constant 0 : index
    %36 = vector.load %arg5[%c0_25, %c0_26] : memref<1x80xf32, #tpu.memory_space<vmem>>, vector<1x80xf32>
    %37 = arith.mulf %35, %36 : vector<1x80xf32>
    %cst_27 = arith.constant dense<0.000000e+00> : vector<1xf32>
    %38 = vector.multi_reduction <add>, %37, %cst_27 [1] : vector<1x80xf32> to vector<1xf32>
    %39 = vector.shape_cast %38 : vector<1xf32> to vector<1x1xf32>
    %c0_28 = arith.constant 0 : index
    %c0_29 = arith.constant 0 : index
    %40 = vector.load %arg6[%c0_28, %c0_29] : memref<1x1xf32, #tpu.memory_space<vmem>>, vector<1x1xf32>
    %41 = arith.addf %39, %40 : vector<1x1xf32>
    %c0_30 = arith.constant 0 : index
    %c0_31 = arith.constant 0 : index
    %42 = vector.load %arg7[%c0_30, %c0_31] : memref<2x1xf32, #tpu.memory_space<vmem>>, vector<1x1xf32>
    tpu.vector_store %arg7[%c0_30, %c0_31], %41 {strides = array<i32>} : memref<2x1xf32, #tpu.memory_space<vmem>>, vector<1x1xf32>,
    %c0_32 = arith.constant 0 : index
    %c0_33 = arith.constant 0 : index
    %43 = vector.load %arg1[%c0_32, %c0_33] : memref<4x392xbf16, #tpu.memory_space<vmem>>, vector<4x392xbf16>
    %c1_34 = arith.constant 1 : index
    %c0_35 = arith.constant 0 : index
    %c0_36 = arith.constant 0 : index
    %44 = vector.load %arg0[%c1_34, %c0_35, %c0_36] : memref<2x392x80xbf16, #tpu.memory_space<vmem>>, vector<1x392x80xbf16>
    %45 = vector.shape_cast %44 : vector<1x392x80xbf16> to vector<392x80xbf16>
    %cst_37 = arith.constant dense<0.000000e+00> : vector<4x80xf32>
    %46 = tpu.matmul %43, %45, %cst_37 {dimension_numbers = #tpu.dot_dimension_numbers<[1], [0], [0], [1], [0, 0, 1, 1], [], []>} : vector<4x392xbf16>, vector<392x80xbf16>, vector<4x80xf32> -> vector<4x80xf32>
    %c0_38 = arith.constant 0 : index
    %c0_39 = arith.constant 0 : index
    %47 = vector.load %arg2[%c0_38, %c0_39] : memref<4x1xf32, #tpu.memory_space<vmem>>, vector<4x1xf32>
    %48 = vector.broadcast %47 : vector<4x1xf32> to vector<4x80xf32>
    %49 = arith.addf %46, %48 : vector<4x80xf32>
    %cst_40 = arith.constant 0.000000e+00 : f32
    %50 = vector.broadcast %cst_40 : f32 to vector<4x80xf32>
    %51 = arith.maximumf %49, %50 : vector<4x80xf32>
    %cst_41 = arith.constant 6.000000e+00 : f32
    %52 = vector.broadcast %cst_41 : f32 to vector<4x80xf32>
    %53 = arith.minimumf %51, %52 : vector<4x80xf32>
    %c0_42 = arith.constant 0 : index
    %c0_43 = arith.constant 0 : index
    %54 = vector.load %arg4[%c0_42, %c0_43] : memref<1x80xf32, #tpu.memory_space<vmem>>, vector<1x80xf32>
    %55 = vector.extract_strided_slice %53 {offsets = [0, 0], sizes = [1, 80], strides = [1, 1]} : vector<4x80xf32> to vector<1x80xf32>
    %c0_44 = arith.constant 0 : index
    %c0_45 = arith.constant 0 : index
    %c0_46 = arith.constant 0 : index
    %56 = vector.load %arg3[%c0_44, %c0_45, %c0_46] : memref<4x80x80xf32, #tpu.memory_space<vmem>>, vector<1x80x80xf32>
    %57 = vector.shape_cast %56 : vector<1x80x80xf32> to vector<80x80xf32>
    %cst_47 = arith.constant dense<0.000000e+00> : vector<1x80xf32>
    %58 = tpu.matmul %55, %57, %cst_47 {dimension_numbers = #tpu.dot_dimension_numbers<[1], [0], [0], [1], [0, 0, 1, 1], [], []>} : vector<1x80xf32>, vector<80x80xf32>, vector<1x80xf32> -> vector<1x80xf32>
    %59 = arith.addf %54, %58 : vector<1x80xf32>
    %60 = vector.extract_strided_slice %53 {offsets = [1, 0], sizes = [1, 80], strides = [1, 1]} : vector<4x80xf32> to vector<1x80xf32>
    %c1_48 = arith.constant 1 : index
    %c0_49 = arith.constant 0 : index
    %c0_50 = arith.constant 0 : index
    %61 = vector.load %arg3[%c1_48, %c0_49, %c0_50] : memref<4x80x80xf32, #tpu.memory_space<vmem>>, vector<1x80x80xf32>
    %62 = vector.shape_cast %61 : vector<1x80x80xf32> to vector<80x80xf32>
    %cst_51 = arith.constant dense<0.000000e+00> : vector<1x80xf32>
    %63 = tpu.matmul %60, %62, %cst_51 {dimension_numbers = #tpu.dot_dimension_numbers<[1], [0], [0], [1], [0, 0, 1, 1], [], []>} : vector<1x80xf32>, vector<80x80xf32>, vector<1x80xf32> -> vector<1x80xf32>
    %64 = arith.addf %59, %63 : vector<1x80xf32>
    %65 = vector.extract_strided_slice %53 {offsets = [2, 0], sizes = [1, 80], strides = [1, 1]} : vector<4x80xf32> to vector<1x80xf32>
    %c2_52 = arith.constant 2 : index
    %c0_53 = arith.constant 0 : index
    %c0_54 = arith.constant 0 : index
    %66 = vector.load %arg3[%c2_52, %c0_53, %c0_54] : memref<4x80x80xf32, #tpu.memory_space<vmem>>, vector<1x80x80xf32>
    %67 = vector.shape_cast %66 : vector<1x80x80xf32> to vector<80x80xf32>
    %cst_55 = arith.constant dense<0.000000e+00> : vector<1x80xf32>
    %68 = tpu.matmul %65, %67, %cst_55 {dimension_numbers = #tpu.dot_dimension_numbers<[1], [0], [0], [1], [0, 0, 1, 1], [], []>} : vector<1x80xf32>, vector<80x80xf32>, vector<1x80xf32> -> vector<1x80xf32>
    %69 = arith.addf %64, %68 : vector<1x80xf32>
    %70 = vector.extract_strided_slice %53 {offsets = [3, 0], sizes = [1, 80], strides = [1, 1]} : vector<4x80xf32> to vector<1x80xf32>
    %c3_56 = arith.constant 3 : index
    %c0_57 = arith.constant 0 : index
    %c0_58 = arith.constant 0 : index
    %71 = vector.load %arg3[%c3_56, %c0_57, %c0_58] : memref<4x80x80xf32, #tpu.memory_space<vmem>>, vector<1x80x80xf32>
    %72 = vector.shape_cast %71 : vector<1x80x80xf32> to vector<80x80xf32>
    %cst_59 = arith.constant dense<0.000000e+00> : vector<1x80xf32>
    %73 = tpu.matmul %70, %72, %cst_59 {dimension_numbers = #tpu.dot_dimension_numbers<[1], [0], [0], [1], [0, 0, 1, 1], [], []>} : vector<1x80xf32>, vector<80x80xf32>, vector<1x80xf32> -> vector<1x80xf32>
    %74 = arith.addf %69, %73 : vector<1x80xf32>
    %cst_60 = arith.constant 0.000000e+00 : f32
    %75 = vector.broadcast %cst_60 : f32 to vector<1x80xf32>
    %76 = arith.maximumf %74, %75 : vector<1x80xf32>
    %cst_61 = arith.constant 6.000000e+00 : f32
    %77 = vector.broadcast %cst_61 : f32 to vector<1x80xf32>
    %78 = arith.minimumf %76, %77 : vector<1x80xf32>
    %c0_62 = arith.constant 0 : index
    %c0_63 = arith.constant 0 : index
    %79 = vector.load %arg5[%c0_62, %c0_63] : memref<1x80xf32, #tpu.memory_space<vmem>>, vector<1x80xf32>
    %80 = arith.mulf %78, %79 : vector<1x80xf32>
    %cst_64 = arith.constant dense<0.000000e+00> : vector<1xf32>
    %81 = vector.multi_reduction <add>, %80, %cst_64 [1] : vector<1x80xf32> to vector<1xf32>
    %82 = vector.shape_cast %81 : vector<1xf32> to vector<1x1xf32>
    %c0_65 = arith.constant 0 : index
    %c0_66 = arith.constant 0 : index
    %83 = vector.load %arg6[%c0_65, %c0_66] : memref<1x1xf32, #tpu.memory_space<vmem>>, vector<1x1xf32>
    %84 = arith.addf %82, %83 : vector<1x1xf32>
    %c1_67 = arith.constant 1 : index
    %c0_68 = arith.constant 0 : index
    %85 = vector.load %arg7[%c1_67, %c0_68] : memref<2x1xf32, #tpu.memory_space<vmem>>, vector<1x1xf32>
    tpu.vector_store %arg7[%c1_67, %c0_68], %84 {strides = array<i32>} : memref<2x1xf32, #tpu.memory_space<vmem>>, vector<1x1xf32>,
    return
  }
}

</mosaic_0001>

<bundles_post_ra>
// kernel: one_hot_sdiff_forward.3
= control target key start
LH: loop header
LB: loop body
LE: loop exit
PB: predicated region body
PF: predicated region fallthrough
CT: control target
= control target key end

     0   :  { %s3002_s12 = smov 0   ;;  %s3004_s13 = smov 0   ;;  %s3628_s0 = inlined_call_operand.vmem [shape: bf16[2,64], index: 0, kind: input, shape index: {}]   ;;  %s3629_s1 = inlined_call_operand.vmem [shape: bf16[64,9216], index: 1, kind: input, shape index: {}]   ;;  %s3630_s2 = inlined_call_operand.vmem [shape: f32[2,1], index: 2, kind: input, shape index: {}]   ;;  %s3631_s3 = inlined_call_operand.vmem [shape: bf16[2,9216], index: 3, kind: output, shape index: {}]  }
   0x1   :  { %s3006_s14 = smov 0  }
   0x2 LB: > { %s2521_s15 = sadd.s32 4294967295, %s2978_s14   ;;  %s3019_s16 = sadd.s32 1, %s2978_s14   ;;  %s2978_s14 = sphi %s3006_s14, %s3634_s14   ;;  %s2974_s13 = sphi %s3004_s13, %s3633_s13   ;;  %s2970_s12 = sphi %s3002_s12, %s3632_s12  }
   0x3   : > { %s38_s17 = ssub.s32 %s2978_s14, %s3019_s16  ;;  %s41_s18 = sadd.s32 1, %s2974_s13 }
   0x4   : > { %p39_p0 = scmp.eq.s32.totalorder %s38_s17, 0  ;;  %p48_p1 = scmp.ne.s32.totalorder %s2974_s13, %s2970_s12 }
   0x5   : > { %p49_p2 = scmp.eq.s32.totalorder %s2978_s14, 0  ;;  %p2524_p4 = scmp.ge.s32.totalorder %s2978_s14, 2 }
   0x6   : > { %s3028_s19 = scalar_select %p39_p0, %s2974_s13, %s41_s18  }
   0x7   : > { %p50_p3 = por %p49_p2, %p48_p1  ;;  %127 = sbr.rel (%p2524_p4) target bundleno = 91 (0x5b), region = 24 }
   0xe   : > { %130 = sbr.rel (!%p50_p3) target bundleno = 91 (0x5b), region = 28  ;;  %s132_s20 = sand.u32 (%p50_p3), 1, %s2974_s13  }
   0xf   : > { %s2710_s21 = smul.u32 (%p50_p3), 144, %s2978_s14 }
  0x10   : > { %s2711_s22 = smul.u32 (%p50_p3), 1152, %s132_s20 }
  0x11   : > { %s3036_s25 = scalar_lea.vmem (%p50_p3), %s3629_s1, %s2710_s21 }
  0x12   : > { %v150_v0 = vld [vmem:[%s3036_s25] sm:$0xff] (%p50_p3)  ;;  %v152_v1 = vld [vmem:[%s3036_s25 + $0x8] sm:$0xff] (%p50_p3)  ;;  %v154_v2 = vld [vmem:[%s3036_s25 + $0x10] sm:$0xff] (%p50_p3)  ;;  %s3041_s26 = scalar_lea.vmem (%p50_p3), [#allocation2], %s2711_s22 }
  0x13   : > { %151 = vst [vmem:[%s3041_s26] sm:$0xff] (%p50_p3), %v150_v0  ;;  %153 = vst [vmem:[%s3041_s26 + $0x8] sm:$0xff] (%p50_p3), %v152_v1  ;;  %v156_v3 = vld [vmem:[%s3036_s25 + $0x18] sm:$0xff] (%p50_p3)  ;;  %v158_v4 = vld [vmem:[%s3036_s25 + $0x20] sm:$0xff] (%p50_p3) }
  0x14   : > { %155 = vst [vmem:[%s3041_s26 + $0x10] sm:$0xff] (%p50_p3), %v154_v2  ;;  %v160_v5 = vld [vmem:[%s3036_s25 + $0x28] sm:$0xff] (%p50_p3)  ;;  %157 = vst [vmem:[%s3041_s26 + $0x18] sm:$0xff] (%p50_p3), %v156_v3  ;;  %v162_v6 = vld [vmem:[%s3036_s25 + $0x30] sm:$0xff] (%p50_p3) }
  0x15   : > { %159 = vst [vmem:[%s3041_s26 + $0x20] sm:$0xff] %v158_v4  ;;  %161 = vst [vmem:[%s3041_s26 + $0x28] sm:$0xff] %v160_v5  ;;  %v164_v7 = vld [vmem:[%s3036_s25 + $0x38] sm:$0xff]  ;;  %v166_v8 = vld [vmem:[%s3036_s25 + $0x40] sm:$0xff] }
  0x16   : > { %163 = vst [vmem:[%s3041_s26 + $0x30] sm:$0xff] %v162_v6  ;;  %165 = vst [vmem:[%s3041_s26 + $0x38] sm:$0xff] %v164_v7  ;;  %v168_v9 = vld [vmem:[%s3036_s25 + $0x48] sm:$0xff]  ;;  %v170_v10 = vld [vmem:[%s3036_s25 + $0x50] sm:$0xff] }
  0x17   : > { %167 = vst [vmem:[%s3041_s26 + $0x40] sm:$0xff] %v166_v8  ;;  %v172_v11 = vld [vmem:[%s3036_s25 + $0x58] sm:$0xff]  ;;  %169 = vst [vmem:[%s3041_s26 + $0x48] sm:$0xff] %v168_v9  ;;  %v174_v12 = vld [vmem:[%s3036_s25 + $0x60] sm:$0xff] }
  0x18   : > { %171 = vst [vmem:[%s3041_s26 + $0x50] sm:$0xff] %v170_v10  ;;  %173 = vst [vmem:[%s3041_s26 + $0x58] sm:$0xff] %v172_v11  ;;  %v176_v13 = vld [vmem:[%s3036_s25 + $0x68] sm:$0xff]  ;;  %v178_v14 = vld [vmem:[%s3036_s25 + $0x70] sm:$0xff] }
  0x19   : > { %175 = vst [vmem:[%s3041_s26 + $0x60] sm:$0xff] %v174_v12  ;;  %177 = vst [vmem:[%s3041_s26 + $0x68] sm:$0xff] %v176_v13  ;;  %v180_v15 = vld [vmem:[%s3036_s25 + $0x78] sm:$0xff]  ;;  %v182_v16 = vld [vmem:[%s3036_s25 + $0x80] sm:$0xff] }
  0x1a   : > { %179 = vst [vmem:[%s3041_s26 + $0x70] sm:$0xff] %v178_v14  ;;  %v184_v17 = vld [vmem:[%s3036_s25 + $0x88] sm:$0xff]  ;;  %181 = vst [vmem:[%s3041_s26 + $0x78] sm:$0xff] %v180_v15  ;;  %v186_v18 = vld [vmem:[%s3036_s25 + $0x120] sm:$0xff] }
  0x1b   : > { %183 = vst [vmem:[%s3041_s26 + $0x80] sm:$0xff] %v182_v16  ;;  %185 = vst [vmem:[%s3041_s26 + $0x88] sm:$0xff] %v184_v17  ;;  %v188_v19 = vld [vmem:[%s3036_s25 + $0x128] sm:$0xff]  ;;  %v190_v20 = vld [vmem:[%s3036_s25 + $0x130] sm:$0xff] }
  0x1c   : > { %187 = vst [vmem:[%s3041_s26 + $0x90] sm:$0xff] %v186_v18  ;;  %189 = vst [vmem:[%s3041_s26 + $0x98] sm:$0xff] %v188_v19  ;;  %v192_v21 = vld [vmem:[%s3036_s25 + $0x138] sm:$0xff]  ;;  %v194_v22 = vld [vmem:[%s3036_s25 + $0x140] sm:$0xff] }
  0x1d   : > { %191 = vst [vmem:[%s3041_s26 + $0xa0] sm:$0xff] %v190_v20  ;;  %v196_v23 = vld [vmem:[%s3036_s25 + $0x148] sm:$0xff]  ;;  %193 = vst [vmem:[%s3041_s26 + $0xa8] sm:$0xff] %v192_v21  ;;  %v198_v24 = vld [vmem:[%s3036_s25 + $0x150] sm:$0xff] }
  0x1e   : > { %195 = vst [vmem:[%s3041_s26 + $0xb0] sm:$0xff] %v194_v22  ;;  %197 = vst [vmem:[%s3041_s26 + $0xb8] sm:$0xff] %v196_v23  ;;  %v200_v25 = vld [vmem:[%s3036_s25 + $0x158] sm:$0xff]  ;;  %v202_v26 = vld [vmem:[%s3036_s25 + $0x160] sm:$0xff] }
  0x1f   : > { %199 = vst [vmem:[%s3041_s26 + $0xc0] sm:$0xff] %v198_v24  ;;  %201 = vst [vmem:[%s3041_s26 + $0xc8] sm:$0xff] %v200_v25  ;;  %v204_v27 = vld [vmem:[%s3036_s25 + $0x168] sm:$0xff]  ;;  %v206_v28 = vld [vmem:[%s3036_s25 + $0x170] sm:$0xff] }
  0x20   : > { %203 = vst [vmem:[%s3041_s26 + $0xd0] sm:$0xff] %v202_v26  ;;  %v208_v29 = vld [vmem:[%s3036_s25 + $0x178] sm:$0xff]  ;;  %205 = vst [vmem:[%s3041_s26 + $0xd8] sm:$0xff] %v204_v27  ;;  %v210_v30 = vld [vmem:[%s3036_s25 + $0x180] sm:$0xff] }
  0x21   : > { %207 = vst [vmem:[%s3041_s26 + $0xe0] sm:$0xff] %v206_v28  ;;  %209 = vst [vmem:[%s3041_s26 + $0xe8] sm:$0xff] %v208_v29  ;;  %v212_v31 = vld [vmem:[%s3036_s25 + $0x188] sm:$0xff]  ;;  %v214_v32 = vld [vmem:[%s3036_s25 + $0x190] sm:$0xff] }
  0x22   : > { %211 = vst [vmem:[%s3041_s26 + $0xf0] sm:$0xff] %v210_v30  ;;  %213 = vst [vmem:[%s3041_s26 + $0xf8] sm:$0xff] %v212_v31  ;;  %v216_v33 = vld [vmem:[%s3036_s25 + $0x198] sm:$0xff]  ;;  %v218_v34 = vld [vmem:[%s3036_s25 + $0x1a0] sm:$0xff] }
  0x23   : > { %215 = vst [vmem:[%s3041_s26 + $0x100] sm:$0xff] %v214_v32  ;;  %v220_v35 = vld [vmem:[%s3036_s25 + $0x1a8] sm:$0xff]  ;;  %217 = vst [vmem:[%s3041_s26 + $0x108] sm:$0xff] %v216_v33  ;;  %v222_v36 = vld [vmem:[%s3036_s25 + $0x240] sm:$0xff] }
  0x24   : > { %219 = vst [vmem:[%s3041_s26 + $0x110] sm:$0xff] %v218_v34  ;;  %221 = vst [vmem:[%s3041_s26 + $0x118] sm:$0xff] %v220_v35  ;;  %v224_v37 = vld [vmem:[%s3036_s25 + $0x248] sm:$0xff]  ;;  %v226_v38 = vld [vmem:[%s3036_s25 + $0x250] sm:$0xff] }
  0x25   : > { %223 = vst [vmem:[%s3041_s26 + $0x120] sm:$0xff] %v222_v36  ;;  %225 = vst [vmem:[%s3041_s26 + $0x128] sm:$0xff] %v224_v37  ;;  %v228_v39 = vld [vmem:[%s3036_s25 + $0x258] sm:$0xff]  ;;  %v230_v40 = vld [vmem:[%s3036_s25 + $0x260] sm:$0xff] }
  0x26   : > { %227 = vst [vmem:[%s3041_s26 + $0x130] sm:$0xff] %v226_v38  ;;  %v232_v41 = vld [vmem:[%s3036_s25 + $0x268] sm:$0xff]  ;;  %229 = vst [vmem:[%s3041_s26 + $0x138] sm:$0xff] %v228_v39  ;;  %v234_v42 = vld [vmem:[%s3036_s25 + $0x270] sm:$0xff] }
  0x27   : > { %231 = vst [vmem:[%s3041_s26 + $0x140] sm:$0xff] %v230_v40  ;;  %233 = vst [vmem:[%s3041_s26 + $0x148] sm:$0xff] %v232_v41  ;;  %v236_v43 = vld [vmem:[%s3036_s25 + $0x278] sm:$0xff]  ;;  %v238_v44 = vld [vmem:[%s3036_s25 + $0x280] sm:$0xff] }
  0x28   : > { %235 = vst [vmem:[%s3041_s26 + $0x150] sm:$0xff] %v234_v42  ;;  %237 = vst [vmem:[%s3041_s26 + $0x158] sm:$0xff] %v236_v43  ;;  %v240_v45 = vld [vmem:[%s3036_s25 + $0x288] sm:$0xff]  ;;  %v242_v46 = vld [vmem:[%s3036_s25 + $0x290] sm:$0xff] }
  0x29   : > { %239 = vst [vmem:[%s3041_s26 + $0x160] sm:$0xff] %v238_v44  ;;  %v244_v47 = vld [vmem:[%s3036_s25 + $0x298] sm:$0xff]  ;;  %241 = vst [vmem:[%s3041_s26 + $0x168] sm:$0xff] %v240_v45  ;;  %v246_v48 = vld [vmem:[%s3036_s25 + $0x2a0] sm:$0xff] }
  0x2a   : > { %243 = vst [vmem:[%s3041_s26 + $0x170] sm:$0xff] %v242_v46  ;;  %245 = vst [vmem:[%s3041_s26 + $0x178] sm:$0xff] %v244_v47  ;;  %v248_v49 = vld [vmem:[%s3036_s25 + $0x2a8] sm:$0xff]  ;;  %v250_v50 = vld [vmem:[%s3036_s25 + $0x2b0] sm:$0xff] }
  0x2b   : > { %247 = vst [vmem:[%s3041_s26 + $0x180] sm:$0xff] %v246_v48  ;;  %249 = vst [vmem:[%s3041_s26 + $0x188] sm:$0xff] %v248_v49  ;;  %v252_v51 = vld [vmem:[%s3036_s25 + $0x2b8] sm:$0xff]  ;;  %v254_v52 = vld [vmem:[%s3036_s25 + $0x2c0] sm:$0xff] }
  0x2c   : > { %251 = vst [vmem:[%s3041_s26 + $0x190] sm:$0xff] %v250_v50  ;;  %v256_v53 = vld [vmem:[%s3036_s25 + $0x2c8] sm:$0xff]  ;;  %253 = vst [vmem:[%s3041_s26 + $0x198] sm:$0xff] %v252_v51  ;;  %v258_v54 = vld [vmem:[%s3036_s25 + $0x360] sm:$0xff] }
  0x2d   : > { %255 = vst [vmem:[%s3041_s26 + $0x1a0] sm:$0xff] %v254_v52  ;;  %257 = vst [vmem:[%s3041_s26 + $0x1a8] sm:$0xff] %v256_v53  ;;  %v260_v55 = vld [vmem:[%s3036_s25 + $0x368] sm:$0xff]  ;;  %v262_v56 = vld [vmem:[%s3036_s25 + $0x370] sm:$0xff] }
  0x2e   : > { %259 = vst [vmem:[%s3041_s26 + $0x1b0] sm:$0xff] %v258_v54  ;;  %261 = vst [vmem:[%s3041_s26 + $0x1b8] sm:$0xff] %v260_v55  ;;  %v264_v57 = vld [vmem:[%s3036_s25 + $0x378] sm:$0xff]  ;;  %v266_v58 = vld [vmem:[%s3036_s25 + $0x380] sm:$0xff] }
  0x2f   : > { %263 = vst [vmem:[%s3041_s26 + $0x1c0] sm:$0xff] %v262_v56  ;;  %v268_v59 = vld [vmem:[%s3036_s25 + $0x388] sm:$0xff]  ;;  %265 = vst [vmem:[%s3041_s26 + $0x1c8] sm:$0xff] %v264_v57  ;;  %v270_v60 = vld [vmem:[%s3036_s25 + $0x390] sm:$0xff] }
  0x30   : > { %267 = vst [vmem:[%s3041_s26 + $0x1d0] sm:$0xff] %v266_v58  ;;  %269 = vst [vmem:[%s3041_s26 + $0x1d8] sm:$0xff] %v268_v59  ;;  %v272_v61 = vld [vmem:[%s3036_s25 + $0x398] sm:$0xff]  ;;  %v274_v62 = vld [vmem:[%s3036_s25 + $0x3a0] sm:$0xff] }
  0x31   : > { %271 = vst [vmem:[%s3041_s26 + $0x1e0] sm:$0xff] %v270_v60  ;;  %273 = vst [vmem:[%s3041_s26 + $0x1e8] sm:$0xff] %v272_v61  ;;  %v276_v63 = vld [vmem:[%s3036_s25 + $0x3a8] sm:$0xff]  ;;  %v278_v0 = vld [vmem:[%s3036_s25 + $0x3b0] sm:$0xff] }
  0x32   : > { %275 = vst [vmem:[%s3041_s26 + $0x1f0] sm:$0xff] %v274_v62  ;;  %v280_v1 = vld [vmem:[%s3036_s25 + $0x3b8] sm:$0xff]  ;;  %277 = vst [vmem:[%s3041_s26 + $0x1f8] sm:$0xff] %v276_v63  ;;  %v282_v2 = vld [vmem:[%s3036_s25 + $0x3c0] sm:$0xff] }
  0x33   : > { %279 = vst [vmem:[%s3041_s26 + $0x200] sm:$0xff] %v278_v0  ;;  %281 = vst [vmem:[%s3041_s26 + $0x208] sm:$0xff] %v280_v1  ;;  %v284_v3 = vld [vmem:[%s3036_s25 + $0x3c8] sm:$0xff]  ;;  %v286_v4 = vld [vmem:[%s3036_s25 + $0x3d0] sm:$0xff] }
  0x34   : > { %283 = vst [vmem:[%s3041_s26 + $0x210] sm:$0xff] %v282_v2  ;;  %285 = vst [vmem:[%s3041_s26 + $0x218] sm:$0xff] %v284_v3  ;;  %v288_v5 = vld [vmem:[%s3036_s25 + $0x3d8] sm:$0xff]  ;;  %v290_v6 = vld [vmem:[%s3036_s25 + $0x3e0] sm:$0xff] }
  0x35   : > { %287 = vst [vmem:[%s3041_s26 + $0x220] sm:$0xff] %v286_v4  ;;  %v292_v7 = vld [vmem:[%s3036_s25 + $0x3e8] sm:$0xff]  ;;  %289 = vst [vmem:[%s3041_s26 + $0x228] sm:$0xff] %v288_v5  ;;  %v294_v8 = vld [vmem:[%s3036_s25 + $0x480] sm:$0xff] }
  0x36   : > { %291 = vst [vmem:[%s3041_s26 + $0x230] sm:$0xff] %v290_v6  ;;  %293 = vst [vmem:[%s3041_s26 + $0x238] sm:$0xff] %v292_v7  ;;  %v296_v9 = vld [vmem:[%s3036_s25 + $0x488] sm:$0xff]  ;;  %v298_v10 = vld [vmem:[%s3036_s25 + $0x490] sm:$0xff] }
  0x37   : > { %295 = vst [vmem:[%s3041_s26 + $0x240] sm:$0xff] %v294_v8  ;;  %297 = vst [vmem:[%s3041_s26 + $0x248] sm:$0xff] %v296_v9  ;;  %v300_v11 = vld [vmem:[%s3036_s25 + $0x498] sm:$0xff]  ;;  %v302_v12 = vld [vmem:[%s3036_s25 + $0x4a0] sm:$0xff] }
  0x38   : > { %299 = vst [vmem:[%s3041_s26 + $0x250] sm:$0xff] %v298_v10  ;;  %v304_v13 = vld [vmem:[%s3036_s25 + $0x4a8] sm:$0xff]  ;;  %301 = vst [vmem:[%s3041_s26 + $0x258] sm:$0xff] %v300_v11  ;;  %v306_v14 = vld [vmem:[%s3036_s25 + $0x4b0] sm:$0xff] }
  0x39   : > { %303 = vst [vmem:[%s3041_s26 + $0x260] sm:$0xff] %v302_v12  ;;  %305 = vst [vmem:[%s3041_s26 + $0x268] sm:$0xff] %v304_v13  ;;  %v308_v15 = vld [vmem:[%s3036_s25 + $0x4b8] sm:$0xff]  ;;  %v310_v16 = vld [vmem:[%s3036_s25 + $0x4c0] sm:$0xff] }
  0x3a   : > { %307 = vst [vmem:[%s3041_s26 + $0x270] sm:$0xff] %v306_v14  ;;  %309 = vst [vmem:[%s3041_s26 + $0x278] sm:$0xff] %v308_v15  ;;  %v312_v17 = vld [vmem:[%s3036_s25 + $0x4c8] sm:$0xff]  ;;  %v314_v18 = vld [vmem:[%s3036_s25 + $0x4d0] sm:$0xff] }
  0x3b   : > { %311 = vst [vmem:[%s3041_s26 + $0x280] sm:$0xff] %v310_v16  ;;  %v316_v19 = vld [vmem:[%s3036_s25 + $0x4d8] sm:$0xff]  ;;  %313 = vst [vmem:[%s3041_s26 + $0x288] sm:$0xff] %v312_v17  ;;  %v318_v20 = vld [vmem:[%s3036_s25 + $0x4e0] sm:$0xff] }
  0x3c   : > { %315 = vst [vmem:[%s3041_s26 + $0x290] sm:$0xff] %v314_v18  ;;  %317 = vst [vmem:[%s3041_s26 + $0x298] sm:$0xff] %v316_v19  ;;  %v320_v21 = vld [vmem:[%s3036_s25 + $0x4e8] sm:$0xff]  ;;  %v322_v22 = vld [vmem:[%s3036_s25 + $0x4f0] sm:$0xff] }
  0x3d   : > { %319 = vst [vmem:[%s3041_s26 + $0x2a0] sm:$0xff] %v318_v20  ;;  %321 = vst [vmem:[%s3041_s26 + $0x2a8] sm:$0xff] %v320_v21  ;;  %v324_v23 = vld [vmem:[%s3036_s25 + $0x4f8] sm:$0xff]  ;;  %v326_v24 = vld [vmem:[%s3036_s25 + $0x500] sm:$0xff] }
  0x3e   : > { %323 = vst [vmem:[%s3041_s26 + $0x2b0] sm:$0xff] %v322_v22  ;;  %v328_v25 = vld [vmem:[%s3036_s25 + $0x508] sm:$0xff]  ;;  %325 = vst [vmem:[%s3041_s26 + $0x2b8] sm:$0xff] %v324_v23  ;;  %v330_v26 = vld [vmem:[%s3036_s25 + $0x5a0] sm:$0xff] }
  0x3f   : > { %327 = vst [vmem:[%s3041_s26 + $0x2c0] sm:$0xff] %v326_v24  ;;  %329 = vst [vmem:[%s3041_s26 + $0x2c8] sm:$0xff] %v328_v25  ;;  %v332_v27 = vld [vmem:[%s3036_s25 + $0x5a8] sm:$0xff]  ;;  %v334_v28 = vld [vmem:[%s3036_s25 + $0x5b0] sm:$0xff] }
  0x40   : > { %331 = vst [vmem:[%s3041_s26 + $0x2d0] sm:$0xff] %v330_v26  ;;  %333 = vst [vmem:[%s3041_s26 + $0x2d8] sm:$0xff] %v332_v27  ;;  %v336_v29 = vld [vmem:[%s3036_s25 + $0x5b8] sm:$0xff]  ;;  %v338_v30 = vld [vmem:[%s3036_s25 + $0x5c0] sm:$0xff] }
  0x41   : > { %335 = vst [vmem:[%s3041_s26 + $0x2e0] sm:$0xff] %v334_v28  ;;  %v340_v31 = vld [vmem:[%s3036_s25 + $0x5c8] sm:$0xff]  ;;  %337 = vst [vmem:[%s3041_s26 + $0x2e8] sm:$0xff] %v336_v29  ;;  %v342_v32 = vld [vmem:[%s3036_s25 + $0x5d0] sm:$0xff] }
  0x42   : > { %339 = vst [vmem:[%s3041_s26 + $0x2f0] sm:$0xff] %v338_v30  ;;  %341 = vst [vmem:[%s3041_s26 + $0x2f8] sm:$0xff] %v340_v31  ;;  %v344_v33 = vld [vmem:[%s3036_s25 + $0x5d8] sm:$0xff]  ;;  %v346_v34 = vld [vmem:[%s3036_s25 + $0x5e0] sm:$0xff] }
  0x43   : > { %343 = vst [vmem:[%s3041_s26 + $0x300] sm:$0xff] %v342_v32  ;;  %345 = vst [vmem:[%s3041_s26 + $0x308] sm:$0xff] %v344_v33  ;;  %v348_v35 = vld [vmem:[%s3036_s25 + $0x5e8] sm:$0xff]  ;;  %v350_v36 = vld [vmem:[%s3036_s25 + $0x5f0] sm:$0xff] }
  0x44   : > { %347 = vst [vmem:[%s3041_s26 + $0x310] sm:$0xff] %v346_v34  ;;  %v352_v37 = vld [vmem:[%s3036_s25 + $0x5f8] sm:$0xff]  ;;  %349 = vst [vmem:[%s3041_s26 + $0x318] sm:$0xff] %v348_v35  ;;  %v354_v38 = vld [vmem:[%s3036_s25 + $0x600] sm:$0xff] }
  0x45   : > { %351 = vst [vmem:[%s3041_s26 + $0x320] sm:$0xff] %v350_v36  ;;  %353 = vst [vmem:[%s3041_s26 + $0x328] sm:$0xff] %v352_v37  ;;  %v356_v39 = vld [vmem:[%s3036_s25 + $0x608] sm:$0xff]  ;;  %v358_v40 = vld [vmem:[%s3036_s25 + $0x610] sm:$0xff] }
  0x46   : > { %355 = vst [vmem:[%s3041_s26 + $0x330] sm:$0xff] %v354_v38  ;;  %357 = vst [vmem:[%s3041_s26 + $0x338] sm:$0xff] %v356_v39  ;;  %v360_v41 = vld [vmem:[%s3036_s25 + $0x618] sm:$0xff]  ;;  %v362_v42 = vld [vmem:[%s3036_s25 + $0x620] sm:$0xff] }
  0x47   : > { %359 = vst [vmem:[%s3041_s26 + $0x340] sm:$0xff] %v358_v40  ;;  %v364_v43 = vld [vmem:[%s3036_s25 + $0x628] sm:$0xff]  ;;  %361 = vst [vmem:[%s3041_s26 + $0x348] sm:$0xff] %v360_v41  ;;  %v366_v44 = vld [vmem:[%s3036_s25 + $0x6c0] sm:$0xff] }
  0x48   : > { %363 = vst [vmem:[%s3041_s26 + $0x350] sm:$0xff] %v362_v42  ;;  %365 = vst [vmem:[%s3041_s26 + $0x358] sm:$0xff] %v364_v43  ;;  %v368_v45 = vld [vmem:[%s3036_s25 + $0x6c8] sm:$0xff]  ;;  %v370_v46 = vld [vmem:[%s3036_s25 + $0x6d0] sm:$0xff] }
  0x49   : > { %367 = vst [vmem:[%s3041_s26 + $0x360] sm:$0xff] %v366_v44  ;;  %369 = vst [vmem:[%s3041_s26 + $0x368] sm:$0xff] %v368_v45  ;;  %v372_v47 = vld [vmem:[%s3036_s25 + $0x6d8] sm:$0xff]  ;;  %v374_v48 = vld [vmem:[%s3036_s25 + $0x6e0] sm:$0xff] }
  0x4a   : > { %371 = vst [vmem:[%s3041_s26 + $0x370] sm:$0xff] %v370_v46  ;;  %v376_v49 = vld [vmem:[%s3036_s25 + $0x6e8] sm:$0xff]  ;;  %373 = vst [vmem:[%s3041_s26 + $0x378] sm:$0xff] %v372_v47  ;;  %v378_v50 = vld [vmem:[%s3036_s25 + $0x6f0] sm:$0xff] }
  0x4b   : > { %375 = vst [vmem:[%s3041_s26 + $0x380] sm:$0xff] %v374_v48  ;;  %377 = vst [vmem:[%s3041_s26 + $0x388] sm:$0xff] %v376_v49  ;;  %v380_v51 = vld [vmem:[%s3036_s25 + $0x6f8] sm:$0xff]  ;;  %v382_v52 = vld [vmem:[%s3036_s25 + $0x700] sm:$0xff] }
  0x4c   : > { %379 = vst [vmem:[%s3041_s26 + $0x390] sm:$0xff] %v378_v50  ;;  %381 = vst [vmem:[%s3041_s26 + $0x398] sm:$0xff] %v380_v51  ;;  %v384_v53 = vld [vmem:[%s3036_s25 + $0x708] sm:$0xff]  ;;  %v386_v54 = vld [vmem:[%s3036_s25 + $0x710] sm:$0xff] }
  0x4d   : > { %383 = vst [vmem:[%s3041_s26 + $0x3a0] sm:$0xff] %v382_v52  ;;  %v388_v55 = vld [vmem:[%s3036_s25 + $0x718] sm:$0xff]  ;;  %385 = vst [vmem:[%s3041_s26 + $0x3a8] sm:$0xff] %v384_v53  ;;  %v390_v56 = vld [vmem:[%s3036_s25 + $0x720] sm:$0xff] }
  0x4e   : > { %387 = vst [vmem:[%s3041_s26 + $0x3b0] sm:$0xff] %v386_v54  ;;  %389 = vst [vmem:[%s3041_s26 + $0x3b8] sm:$0xff] %v388_v55  ;;  %v392_v57 = vld [vmem:[%s3036_s25 + $0x728] sm:$0xff]  ;;  %v394_v58 = vld [vmem:[%s3036_s25 + $0x730] sm:$0xff] }
  0x4f   : > { %391 = vst [vmem:[%s3041_s26 + $0x3c0] sm:$0xff] %v390_v56  ;;  %393 = vst [vmem:[%s3041_s26 + $0x3c8] sm:$0xff] %v392_v57  ;;  %v396_v59 = vld [vmem:[%s3036_s25 + $0x738] sm:$0xff]  ;;  %v398_v60 = vld [vmem:[%s3036_s25 + $0x740] sm:$0xff] }
  0x50   : > { %395 = vst [vmem:[%s3041_s26 + $0x3d0] sm:$0xff] %v394_v58  ;;  %v400_v61 = vld [vmem:[%s3036_s25 + $0x748] sm:$0xff]  ;;  %397 = vst [vmem:[%s3041_s26 + $0x3d8] sm:$0xff] %v396_v59  ;;  %v402_v62 = vld [vmem:[%s3036_s25 + $0x7e0] sm:$0xff] }
  0x51   : > { %399 = vst [vmem:[%s3041_s26 + $0x3e0] sm:$0xff] %v398_v60  ;;  %401 = vst [vmem:[%s3041_s26 + $0x3e8] sm:$0xff] %v400_v61  ;;  %v404_v63 = vld [vmem:[%s3036_s25 + $0x7e8] sm:$0xff]  ;;  %v406_v0 = vld [vmem:[%s3036_s25 + $0x7f0] sm:$0xff] }
  0x52   : > { %403 = vst [vmem:[%s3041_s26 + $0x3f0] sm:$0xff] %v402_v62  ;;  %405 = vst [vmem:[%s3041_s26 + $0x3f8] sm:$0xff] %v404_v63  ;;  %v408_v1 = vld [vmem:[%s3036_s25 + $0x7f8] sm:$0xff]  ;;  %v410_v2 = vld [vmem:[%s3036_s25 + $0x800] sm:$0xff] }
  0x53   : > { %407 = vst [vmem:[%s3041_s26 + $0x400] sm:$0xff] %v406_v0  ;;  %v412_v3 = vld [vmem:[%s3036_s25 + $0x808] sm:$0xff]  ;;  %409 = vst [vmem:[%s3041_s26 + $0x408] sm:$0xff] %v408_v1  ;;  %v414_v4 = vld [vmem:[%s3036_s25 + $0x810] sm:$0xff] }
  0x54   : > { %411 = vst [vmem:[%s3041_s26 + $0x410] sm:$0xff] %v410_v2  ;;  %413 = vst [vmem:[%s3041_s26 + $0x418] sm:$0xff] %v412_v3  ;;  %v416_v5 = vld [vmem:[%s3036_s25 + $0x818] sm:$0xff]  ;;  %v418_v6 = vld [vmem:[%s3036_s25 + $0x820] sm:$0xff] }
  0x55   : > { %415 = vst [vmem:[%s3041_s26 + $0x420] sm:$0xff] %v414_v4  ;;  %417 = vst [vmem:[%s3041_s26 + $0x428] sm:$0xff] %v416_v5  ;;  %v420_v7 = vld [vmem:[%s3036_s25 + $0x828] sm:$0xff]  ;;  %v422_v8 = vld [vmem:[%s3036_s25 + $0x830] sm:$0xff] }
  0x56   : > { %419 = vst [vmem:[%s3041_s26 + $0x430] sm:$0xff] %v418_v6  ;;  %v424_v9 = vld [vmem:[%s3036_s25 + $0x838] sm:$0xff]  ;;  %421 = vst [vmem:[%s3041_s26 + $0x438] sm:$0xff] %v420_v7  ;;  %v426_v10 = vld [vmem:[%s3036_s25 + $0x840] sm:$0xff] }
  0x57   : > { %423 = vst [vmem:[%s3041_s26 + $0x440] sm:$0xff] %v422_v8  ;;  %425 = vst [vmem:[%s3041_s26 + $0x448] sm:$0xff] %v424_v9  ;;  %v428_v11 = vld [vmem:[%s3036_s25 + $0x848] sm:$0xff]  ;;  %v430_v12 = vld [vmem:[%s3036_s25 + $0x850] sm:$0xff] }
  0x58   : > { %427 = vst [vmem:[%s3041_s26 + $0x450] sm:$0xff] %v426_v10  ;;  %429 = vst [vmem:[%s3041_s26 + $0x458] sm:$0xff] %v428_v11  ;;  %v432_v13 = vld [vmem:[%s3036_s25 + $0x858] sm:$0xff]  ;;  %v434_v14 = vld [vmem:[%s3036_s25 + $0x860] sm:$0xff] }
  0x59   : > { %431 = vst [vmem:[%s3041_s26 + $0x460] sm:$0xff] %v430_v12  ;;  %v436_v15 = vld [vmem:[%s3036_s25 + $0x868] sm:$0xff]  ;;  %433 = vst [vmem:[%s3041_s26 + $0x468] sm:$0xff] %v432_v13 }
  0x5a   : > { %435 = vst [vmem:[%s3041_s26 + $0x470] sm:$0xff] %v434_v14  ;;  %437 = vst [vmem:[%s3041_s26 + $0x478] sm:$0xff] %v436_v15 }
  0x5b PF: > { %p2526_p5 = scmp.ge.s32.totalorder %s2978_s14, 1  ;;  %p442_p6 = scmp.lt.s32.totalorder %s2978_s14, 3 }
  0x5d   : > { %p443_p7 = pnand %p2526_p5, %p442_p6 }
  0x5e   : > { %s449_s27 = sand.u32 (!%p443_p7), 1, %s2970_s12   ;;  %v2980_v16 = vmov (!%p443_p7), 0   ;;  %v623_v17 = vld [vmem:[%s3630_s2] sm:$0x3] (!%p443_p7)  ;;  %vm1349_vm0 = vcmask (!%p443_p7), 523264   ;;  %s472_s7 = smul.u32 (!%p443_p7), 36, %s2521_s15 }
  0x5f   : > { %446 = sbr.rel (%p443_p7) target bundleno = 470 (0x1d6), region = 51  ;;  %1385 = vmatprep.mubr.bf16.mxu0 (!%p443_p7), %v2980_v16  ;;  %1426 = vmatprep.mubr.bf16.mxu1 (!%p443_p7), %v2980_v16  ;;  %v3360_v36 = vld [vmem:[%s3628_s0] sm:$0x1] (!%p443_p7) }
  0x60   : > { %s2712_s28 = smul.u32 (!%p443_p7), 1152, %s449_s27  ;;  %2739 = vset.pattern.permute.xlu0 (!%p443_p7), %v2980_v16  ;;  %p473_p8 = scmp.lt.s32.totalorder (!%p443_p7), %s472_s7, 71 }
  0x61   : > { %626 = vperm.xlu0 (!%p443_p7), %2739, %v623_v17  }
  0x62   : > { %s3337_s4 = scalar_lea.vmem (!%p443_p7), [#allocation2], %s2712_s28 }
  0x63   : > { %v2740_v18 = vld [vmem:[%s3337_s4 + $0x4] ss:$144 sps:$4 sm:$0xff] (!%p443_p7)   ;;  %v2742_v19 = vld [vmem:[%s3337_s4 + $0xc] ss:$144 sps:$4 sm:$0xff] (!%p443_p7)   ;;  %v2744_v20 = vld [vmem:[%s3337_s4] ss:$144 sps:$4 sm:$0xff] (!%p443_p7)  }
  0x64   : > { %1353 = vmatprep.subr.bf16.mxu0 (!%p443_p7), %v2740_v18  ;;  %v2745_v21 = vld [vmem:[%s3337_s4 + $0x8] ss:$144 sps:$4 sm:$0xff] (!%p443_p7)   ;;  %1394 = vmatprep.subr.bf16.mxu1 (!%p443_p7), %v2742_v19  ;;  %v2746_v22 = vld [vmem:[%s3337_s4 + $0x124] ss:$144 sps:$4 sm:$0xff] (!%p443_p7)   ;;  %v2748_v23 = vld [vmem:[%s3337_s4 + $0x12c] ss:$144 sps:$4 sm:$0xff] (!%p443_p7)  }
  0x65   : > { %1354 = vmatpush1.bf16.msra.mxu0 (!%p443_p7), %v2744_v20  ;;  %1395 = vmatpush1.bf16.msra.mxu1 (!%p443_p7), %v2745_v21  ;;  %v2750_v24 = vld [vmem:[%s3337_s4 + $0x120] ss:$144 sps:$4 sm:$0xff] (!%p443_p7)   ;;  %v2751_v25 = vld [vmem:[%s3337_s4 + $0x128] ss:$144 sps:$4 sm:$0xff] (!%p443_p7)   ;;  %v2752_v26 = vld [vmem:[%s3337_s4 + $0x244] ss:$144 sps:$4 sm:$0xff] (!%p443_p7)  }
  0x66   : > { %1355 = vmatprep.subr.bf16.mxu0 %v2746_v22  ;;  %1396 = vmatprep.subr.bf16.mxu1 %v2748_v23  ;;  %v2754_v27 = vld [vmem:[%s3337_s4 + $0x24c] ss:$144 sps:$4 sm:$0xff]   ;;  %v2756_v28 = vld [vmem:[%s3337_s4 + $0x240] ss:$144 sps:$4 sm:$0xff]   ;;  %v2757_v29 = vld [vmem:[%s3337_s4 + $0x248] ss:$144 sps:$4 sm:$0xff]  }
  0x67   : > { %v2758_v30 = vld [vmem:[%s3337_s4 + $0x364] ss:$144 sps:$4 sm:$0xff]   ;;  %v2760_v31 = vld [vmem:[%s3337_s4 + $0x36c] ss:$144 sps:$4 sm:$0xff]   ;;  %v2762_v32 = vld [vmem:[%s3337_s4 + $0x360] ss:$144 sps:$4 sm:$0xff]  }
  0x68   : > { %v2763_v33 = vld [vmem:[%s3337_s4 + $0x368] ss:$144 sps:$4 sm:$0xff]   ;;  %v2766_v34 = vld [vmem:[%s3337_s4 + $0x14] ss:$144 sps:$4 sm:$0xff]   ;;  %v2769_v35 = vld [vmem:[%s3337_s4 + $0x1c] ss:$144 sps:$4 sm:$0xff]  }
  0x69   : > { %1356 = vmatpush1.bf16.msra.mxu0 %v2750_v24  ;;  %1397 = vmatpush1.bf16.msra.mxu1 %v2751_v25  ;;  %v2764_v37 = vld [vmem:[%s3337_s4 + $0x10] ss:$144 sps:$4 sm:$0xff]   ;;  %v2767_v38 = vld [vmem:[%s3337_s4 + $0x18] ss:$144 sps:$4 sm:$0xff]   ;;  %v2772_v39 = vld [vmem:[%s3337_s4 + $0x134] ss:$144 sps:$4 sm:$0xff]  }
  0x6a   : > { %1357 = vmatprep.subr.bf16.mxu0 %v2752_v26  ;;  %1398 = vmatprep.subr.bf16.mxu1 %v2754_v27  ;;  %v2775_v40 = vld [vmem:[%s3337_s4 + $0x13c] ss:$144 sps:$4 sm:$0xff]   ;;  %v2770_v41 = vld [vmem:[%s3337_s4 + $0x130] ss:$144 sps:$4 sm:$0xff]   ;;  %v2773_v42 = vld [vmem:[%s3337_s4 + $0x138] ss:$144 sps:$4 sm:$0xff]  }
  0x6b   : > { %v2778_v43 = vld [vmem:[%s3337_s4 + $0x254] ss:$144 sps:$4 sm:$0xff]   ;;  %v2781_v44 = vld [vmem:[%s3337_s4 + $0x25c] ss:$144 sps:$4 sm:$0xff]   ;;  %v2776_v45 = vld [vmem:[%s3337_s4 + $0x250] ss:$144 sps:$4 sm:$0xff]  }
  0x6c   : > { %v2779_v46 = vld [vmem:[%s3337_s4 + $0x258] ss:$144 sps:$4 sm:$0xff]   ;;  %v2784_v47 = vld [vmem:[%s3337_s4 + $0x374] ss:$144 sps:$4 sm:$0xff]   ;;  %v2787_v48 = vld [vmem:[%s3337_s4 + $0x37c] ss:$144 sps:$4 sm:$0xff]  }
  0x6d   : > { %1358 = vmatpush1.bf16.msra.mxu0 %v2756_v28  ;;  %1399 = vmatpush1.bf16.msra.mxu1 %v2757_v29  ;;  %v2782_v49 = vld [vmem:[%s3337_s4 + $0x370] ss:$144 sps:$4 sm:$0xff]   ;;  %v2785_v50 = vld [vmem:[%s3337_s4 + $0x378] ss:$144 sps:$4 sm:$0xff]   ;;  %v2790_v51 = vld [vmem:[%s3337_s4 + $0x24] ss:$144 sps:$4 sm:$0xff]  }
  0x6e   : > { %1359 = vmatprep.subr.bf16.mxu0 %v2758_v30  ;;  %1400 = vmatprep.subr.bf16.mxu1 %v2760_v31  ;;  %v2793_v52 = vld [vmem:[%s3337_s4 + $0x2c] ss:$144 sps:$4 sm:$0xff]   ;;  %v2788_v53 = vld [vmem:[%s3337_s4 + $0x20] ss:$144 sps:$4 sm:$0xff]   ;;  %v2791_v54 = vld [vmem:[%s3337_s4 + $0x28] ss:$144 sps:$4 sm:$0xff]  }
  0x6f   : > { %v2796_v55 = vld [vmem:[%s3337_s4 + $0x144] ss:$144 sps:$4 sm:$0xff]   ;;  %v2799_v56 = vld [vmem:[%s3337_s4 + $0x14c] ss:$144 sps:$4 sm:$0xff]   ;;  %v2794_v57 = vld [vmem:[%s3337_s4 + $0x140] ss:$144 sps:$4 sm:$0xff]  }
  0x70   : > { %v2797_v58 = vld [vmem:[%s3337_s4 + $0x148] ss:$144 sps:$4 sm:$0xff]   ;;  %v2802_v59 = vld [vmem:[%s3337_s4 + $0x264] ss:$144 sps:$4 sm:$0xff]   ;;  %v2805_v60 = vld [vmem:[%s3337_s4 + $0x26c] ss:$144 sps:$4 sm:$0xff]  }
  0x71   : > { %1360 = vmatpush1.bf16.msra.mxu0 %v2762_v32  ;;  %1401 = vmatpush1.bf16.msra.mxu1 %v2763_v33  ;;  %v2800_v61 = vld [vmem:[%s3337_s4 + $0x260] ss:$144 sps:$4 sm:$0xff]   ;;  %v2803_v62 = vld [vmem:[%s3337_s4 + $0x268] ss:$144 sps:$4 sm:$0xff]   ;;  %v2808_v63 = vld [vmem:[%s3337_s4 + $0x384] ss:$144 sps:$4 sm:$0xff]  }
  0x72   : > { %1435 = vmatprep.subr.bf16.mxu0 %v2766_v34  ;;  %1476 = vmatprep.subr.bf16.mxu1 %v2769_v35  ;;  %v2811_v0 = vld [vmem:[%s3337_s4 + $0x38c] ss:$144 sps:$4 sm:$0xff]   ;;  %v2806_v1 = vld [vmem:[%s3337_s4 + $0x380] ss:$144 sps:$4 sm:$0xff]   ;;  %v2809_v2 = vld [vmem:[%s3337_s4 + $0x388] ss:$144 sps:$4 sm:$0xff]  }
  0x73   : > { %v2814_v3 = vld [vmem:[%s3337_s4 + $0x34] ss:$144 sps:$4 sm:$0xff]   ;;  %v2817_v4 = vld [vmem:[%s3337_s4 + $0x3c] ss:$144 sps:$4 sm:$0xff]   ;;  %v2812_v5 = vld [vmem:[%s3337_s4 + $0x30] ss:$144 sps:$4 sm:$0xff]  }
  0x74   : > { %2671 = vmatmul.mubr.msk.bf16.vlgmr.msra.gmra.mrb[0].mxu0 %vm1349_vm0, %v3360_v36  ;;  %2672 = vmatmul.mubr.msk.bf16.vlgmr.msra.gmra.mrb[0].mxu1 %vm1349_vm0, %v3360_v36  ;;  %v2815_v6 = vld [vmem:[%s3337_s4 + $0x38] ss:$144 sps:$4 sm:$0xff]   ;;  %v2820_v7 = vld [vmem:[%s3337_s4 + $0x154] ss:$144 sps:$4 sm:$0xff]   ;;  %v2823_v8 = vld [vmem:[%s3337_s4 + $0x15c] ss:$144 sps:$4 sm:$0xff]  }
  0x75   : > { %1436 = vmatpush1.bf16.msra.mxu0 %v2764_v37  ;;  %1477 = vmatpush1.bf16.msra.mxu1 %v2767_v38  ;;  %v2818_v9 = vld [vmem:[%s3337_s4 + $0x150] ss:$144 sps:$4 sm:$0xff]   ;;  %v2821_v10 = vld [vmem:[%s3337_s4 + $0x158] ss:$144 sps:$4 sm:$0xff]   ;;  %v2826_v11 = vld [vmem:[%s3337_s4 + $0x274] ss:$144 sps:$4 sm:$0xff]  }
  0x76   : > { %1437 = vmatprep.subr.bf16.mxu0 %v2772_v39  ;;  %1478 = vmatprep.subr.bf16.mxu1 %v2775_v40  ;;  %v2829_v12 = vld [vmem:[%s3337_s4 + $0x27c] ss:$144 sps:$4 sm:$0xff]   ;;  %v2824_v13 = vld [vmem:[%s3337_s4 + $0x270] ss:$144 sps:$4 sm:$0xff]   ;;  %v2827_v14 = vld [vmem:[%s3337_s4 + $0x278] ss:$144 sps:$4 sm:$0xff]  }
  0x77   : > { %1467 = vmatprep.mubr.bf16.mxu0 %v2980_v16  ;;  %1508 = vmatprep.mubr.bf16.mxu1 %v2980_v16  ;;  %v2832_v15 = vld [vmem:[%s3337_s4 + $0x394] ss:$144 sps:$4 sm:$0xff]   ;;  %v2835_v17 = vld [vmem:[%s3337_s4 + $0x39c] ss:$144 sps:$4 sm:$0xff]   ;;  %v2830_v18 = vld [vmem:[%s3337_s4 + $0x390] ss:$144 sps:$4 sm:$0xff]  }
  0x78   : > { %v2833_v19 = vld [vmem:[%s3337_s4 + $0x398] ss:$144 sps:$4 sm:$0xff]   ;;  %v2838_v20 = vld [vmem:[%s3337_s4 + $0x44] ss:$144 sps:$4 sm:$0xff]   ;;  %v2841_v21 = vld [vmem:[%s3337_s4 + $0x4c] ss:$144 sps:$4 sm:$0xff]  }
  0x79   : > { %1438 = vmatpush1.bf16.msra.mxu0 %v2770_v41  ;;  %1479 = vmatpush1.bf16.msra.mxu1 %v2773_v42  ;;  %v2836_v22 = vld [vmem:[%s3337_s4 + $0x40] ss:$144 sps:$4 sm:$0xff]   ;;  %v2839_v23 = vld [vmem:[%s3337_s4 + $0x48] ss:$144 sps:$4 sm:$0xff]   ;;  %v2844_v24 = vld [vmem:[%s3337_s4 + $0x164] ss:$144 sps:$4 sm:$0xff]  }
  0x7a   : > { %1439 = vmatprep.subr.bf16.mxu0 %v2778_v43  ;;  %1480 = vmatprep.subr.bf16.mxu1 %v2781_v44  ;;  %v2847_v25 = vld [vmem:[%s3337_s4 + $0x16c] ss:$144 sps:$4 sm:$0xff]   ;;  %v2842_v26 = vld [vmem:[%s3337_s4 + $0x160] ss:$144 sps:$4 sm:$0xff]   ;;  %v2845_v27 = vld [vmem:[%s3337_s4 + $0x168] ss:$144 sps:$4 sm:$0xff]  }
  0x7b   : > { %v2850_v28 = vld [vmem:[%s3337_s4 + $0x284] ss:$144 sps:$4 sm:$0xff]   ;;  %v2853_v29 = vld [vmem:[%s3337_s4 + $0x28c] ss:$144 sps:$4 sm:$0xff]   ;;  %v2848_v30 = vld [vmem:[%s3337_s4 + $0x280] ss:$144 sps:$4 sm:$0xff]  }
  0x7c   : > { %v2851_v31 = vld [vmem:[%s3337_s4 + $0x288] ss:$144 sps:$4 sm:$0xff]   ;;  %v2856_v32 = vld [vmem:[%s3337_s4 + $0x3a4] ss:$144 sps:$4 sm:$0xff]   ;;  %v2859_v33 = vld [vmem:[%s3337_s4 + $0x3ac] ss:$144 sps:$4 sm:$0xff]  }
  0x7d   : > { %1440 = vmatpush1.bf16.msra.mxu0 %v2776_v45  ;;  %1481 = vmatpush1.bf16.msra.mxu1 %v2779_v46  ;;  %v2854_v34 = vld [vmem:[%s3337_s4 + $0x3a0] ss:$144 sps:$4 sm:$0xff]   ;;  %v2857_v35 = vld [vmem:[%s3337_s4 + $0x3a8] ss:$144 sps:$4 sm:$0xff]   ;;  %v2862_v37 = vld [vmem:[%s3337_s4 + $0x54] ss:$144 sps:$4 sm:$0xff]  }
  0x7e   : > { %1441 = vmatprep.subr.bf16.mxu0 %v2784_v47  ;;  %1482 = vmatprep.subr.bf16.mxu1 %v2787_v48  ;;  %v2865_v38 = vld [vmem:[%s3337_s4 + $0x5c] ss:$144 sps:$4 sm:$0xff]   ;;  %v2860_v39 = vld [vmem:[%s3337_s4 + $0x50] ss:$144 sps:$4 sm:$0xff]   ;;  %v2863_v40 = vld [vmem:[%s3337_s4 + $0x58] ss:$144 sps:$4 sm:$0xff]  }
  0x7f   : > { %v2868_v41 = vld [vmem:[%s3337_s4 + $0x174] ss:$144 sps:$4 sm:$0xff]   ;;  %v2871_v42 = vld [vmem:[%s3337_s4 + $0x17c] ss:$144 sps:$4 sm:$0xff]   ;;  %v2866_v43 = vld [vmem:[%s3337_s4 + $0x170] ss:$144 sps:$4 sm:$0xff]  }
  0x80   : > { %v2869_v44 = vld [vmem:[%s3337_s4 + $0x178] ss:$144 sps:$4 sm:$0xff]   ;;  %v2874_v45 = vld [vmem:[%s3337_s4 + $0x294] ss:$144 sps:$4 sm:$0xff]   ;;  %v2877_v46 = vld [vmem:[%s3337_s4 + $0x29c] ss:$144 sps:$4 sm:$0xff]  }
  0x81   : > { %1442 = vmatpush1.bf16.msra.mxu0 %v2782_v49  ;;  %1483 = vmatpush1.bf16.msra.mxu1 %v2785_v50  ;;  %v2872_v47 = vld [vmem:[%s3337_s4 + $0x290] ss:$144 sps:$4 sm:$0xff]   ;;  %v2875_v48 = vld [vmem:[%s3337_s4 + $0x298] ss:$144 sps:$4 sm:$0xff]   ;;  %v2880_v49 = vld [vmem:[%s3337_s4 + $0x3b4] ss:$144 sps:$4 sm:$0xff]  }
  0x82   : > { %1517 = vmatprep.subr.bf16.mxu0 %v2790_v51  ;;  %1558 = vmatprep.subr.bf16.mxu1 %v2793_v52  ;;  %v2883_v50 = vld [vmem:[%s3337_s4 + $0x3bc] ss:$144 sps:$4 sm:$0xff]   ;;  %v2878_v51 = vld [vmem:[%s3337_s4 + $0x3b0] ss:$144 sps:$4 sm:$0xff]   ;;  %v2881_v52 = vld [vmem:[%s3337_s4 + $0x3b8] ss:$144 sps:$4 sm:$0xff]  }
  0x83   : > { %s3636_s7 = smov (!%p473_p8, %s472_s7), 71 }
  0x84   : > { %2673 = vmatmul.mubr.msk.bf16.vlgmr.msra.gmra.mrb[4].mxu0 %vm1349_vm0, %v3360_v36  ;;  %2674 = vmatmul.mubr.msk.bf16.vlgmr.msra.gmra.mrb[4].mxu1 %vm1349_vm0, %v3360_v36  ;;  %s3563_s10 = scalar_lea.vmem %s3631_s3, %s3636_s7 }
  0x85   : > { %1518 = vmatpush1.bf16.msra.mxu0 %v2788_v53  ;;  %1559 = vmatpush1.bf16.msra.mxu1 %v2791_v54  ;;  %v2886_v53 = vld [vmem:[%s3337_s4 + $0x64] ss:$144 sps:$4 sm:$0xff]   ;;  %v2889_v54 = vld [vmem:[%s3337_s4 + $0x6c] ss:$144 sps:$4 sm:$0xff]  }
  0x86   : > { %1519 = vmatprep.subr.bf16.mxu0 %v2796_v55  ;;  %1560 = vmatprep.subr.bf16.mxu1 %v2799_v56  ;;  %v2884_v55 = vld [vmem:[%s3337_s4 + $0x60] ss:$144 sps:$4 sm:$0xff]   ;;  %v2887_v56 = vld [vmem:[%s3337_s4 + $0x68] ss:$144 sps:$4 sm:$0xff]  }
  0x87   : > { %1549 = vmatprep.mubr.bf16.mxu0 %v2980_v16  ;;  %1590 = vmatprep.mubr.bf16.mxu1 %v2980_v16 }
  0x89   : > { %1520 = vmatpush1.bf16.msra.mxu0 %v2794_v57  ;;  %1561 = vmatpush1.bf16.msra.mxu1 %v2797_v58  ;;  %v2892_v57 = vld [vmem:[%s3337_s4 + $0x184] ss:$144 sps:$4 sm:$0xff]   ;;  %v2895_v58 = vld [vmem:[%s3337_s4 + $0x18c] ss:$144 sps:$4 sm:$0xff]  }
  0x8a   : > { %1521 = vmatprep.subr.bf16.mxu0 %v2802_v59  ;;  %1562 = vmatprep.subr.bf16.mxu1 %v2805_v60  ;;  %v2890_v59 = vld [vmem:[%s3337_s4 + $0x180] ss:$144 sps:$4 sm:$0xff]   ;;  %v2893_v60 = vld [vmem:[%s3337_s4 + $0x188] ss:$144 sps:$4 sm:$0xff]  }
  0x8d   : > { %1522 = vmatpush1.bf16.msra.mxu0 %v2800_v61  ;;  %1563 = vmatpush1.bf16.msra.mxu1 %v2803_v62  ;;  %v2898_v61 = vld [vmem:[%s3337_s4 + $0x2a4] ss:$144 sps:$4 sm:$0xff]   ;;  %v2901_v62 = vld [vmem:[%s3337_s4 + $0x2ac] ss:$144 sps:$4 sm:$0xff]  }
  0x8e   : > { %1523 = vmatprep.subr.bf16.mxu0 %v2808_v63  ;;  %1564 = vmatprep.subr.bf16.mxu1 %v2811_v0  ;;  %v2896_v63 = vld [vmem:[%s3337_s4 + $0x2a0] ss:$144 sps:$4 sm:$0xff]   ;;  %v2899_v0 = vld [vmem:[%s3337_s4 + $0x2a8] ss:$144 sps:$4 sm:$0xff]  }
  0x91   : > { %1524 = vmatpush1.bf16.msra.mxu0 %v2806_v1  ;;  %1565 = vmatpush1.bf16.msra.mxu1 %v2809_v2  ;;  %v2904_v1 = vld [vmem:[%s3337_s4 + $0x3c4] ss:$144 sps:$4 sm:$0xff]   ;;  %v2907_v2 = vld [vmem:[%s3337_s4 + $0x3cc] ss:$144 sps:$4 sm:$0xff]  }
  0x92   : > { %1599 = vmatprep.subr.bf16.mxu0 %v2814_v3  ;;  %1640 = vmatprep.subr.bf16.mxu1 %v2817_v4  ;;  %v2902_v3 = vld [vmem:[%s3337_s4 + $0x3c0] ss:$144 sps:$4 sm:$0xff]   ;;  %v2905_v4 = vld [vmem:[%s3337_s4 + $0x3c8] ss:$144 sps:$4 sm:$0xff]  }
  0x94   : > { %2675 = vmatmul.mubr.msk.bf16.vlgmr.msra.gmra.mrb[8].mxu0 %vm1349_vm0, %v3360_v36  ;;  %2676 = vmatmul.mubr.msk.bf16.vlgmr.msra.gmra.mrb[8].mxu1 %vm1349_vm0, %v3360_v36 }
  0x95   : > { %1600 = vmatpush1.bf16.msra.mxu0 %v2812_v5  ;;  %1641 = vmatpush1.bf16.msra.mxu1 %v2815_v6  ;;  %v2910_v5 = vld [vmem:[%s3337_s4 + $0x74] ss:$144 sps:$4 sm:$0xff]   ;;  %v2913_v6 = vld [vmem:[%s3337_s4 + $0x7c] ss:$144 sps:$4 sm:$0xff]  }
  0x96   : > { %1601 = vmatprep.subr.bf16.mxu0 %v2820_v7  ;;  %1642 = vmatprep.subr.bf16.mxu1 %v2823_v8  ;;  %v2908_v7 = vld [vmem:[%s3337_s4 + $0x70] ss:$144 sps:$4 sm:$0xff]   ;;  %v2911_v8 = vld [vmem:[%s3337_s4 + $0x78] ss:$144 sps:$4 sm:$0xff]  }
  0x97   : > { %1631 = vmatprep.mubr.bf16.mxu0 %v2980_v16  ;;  %1672 = vmatprep.mubr.bf16.mxu1 %v2980_v16 }
  0x99   : > { %1602 = vmatpush1.bf16.msra.mxu0 %v2818_v9  ;;  %1643 = vmatpush1.bf16.msra.mxu1 %v2821_v10  ;;  %v2916_v9 = vld [vmem:[%s3337_s4 + $0x194] ss:$144 sps:$4 sm:$0xff]   ;;  %v2919_v10 = vld [vmem:[%s3337_s4 + $0x19c] ss:$144 sps:$4 sm:$0xff]  }
  0x9a   : > { %1603 = vmatprep.subr.bf16.mxu0 %v2826_v11  ;;  %1644 = vmatprep.subr.bf16.mxu1 %v2829_v12  ;;  %v2914_v11 = vld [vmem:[%s3337_s4 + $0x190] ss:$144 sps:$4 sm:$0xff]   ;;  %v2917_v12 = vld [vmem:[%s3337_s4 + $0x198] ss:$144 sps:$4 sm:$0xff]  }
  0x9d   : > { %1604 = vmatpush1.bf16.msra.mxu0 %v2824_v13  ;;  %1645 = vmatpush1.bf16.msra.mxu1 %v2827_v14  ;;  %v2922_v13 = vld [vmem:[%s3337_s4 + $0x2b4] ss:$144 sps:$4 sm:$0xff]   ;;  %v2925_v14 = vld [vmem:[%s3337_s4 + $0x2bc] ss:$144 sps:$4 sm:$0xff]  }
  0x9e   : > { %1605 = vmatprep.subr.bf16.mxu0 %v2832_v15  ;;  %1646 = vmatprep.subr.bf16.mxu1 %v2835_v17  ;;  %v2920_v15 = vld [vmem:[%s3337_s4 + $0x2b0] ss:$144 sps:$4 sm:$0xff]   ;;  %v2923_v17 = vld [vmem:[%s3337_s4 + $0x2b8] ss:$144 sps:$4 sm:$0xff]  }
  0xa1   : > { %1606 = vmatpush1.bf16.msra.mxu0 %v2830_v18  ;;  %1647 = vmatpush1.bf16.msra.mxu1 %v2833_v19  ;;  %v2928_v18 = vld [vmem:[%s3337_s4 + $0x3d4] ss:$144 sps:$4 sm:$0xff]   ;;  %v2931_v19 = vld [vmem:[%s3337_s4 + $0x3dc] ss:$144 sps:$4 sm:$0xff]  }
  0xa2   : > { %1681 = vmatprep.subr.bf16.mxu0 %v2838_v20  ;;  %1722 = vmatprep.subr.bf16.mxu1 %v2841_v21  ;;  %v2926_v20 = vld [vmem:[%s3337_s4 + $0x3d0] ss:$144 sps:$4 sm:$0xff]   ;;  %v2929_v21 = vld [vmem:[%s3337_s4 + $0x3d8] ss:$144 sps:$4 sm:$0xff]  }
  0xa4   : > { %2677 = vmatmul.mubr.msk.bf16.vlgmr.msra.gmra.mrb[12].mxu0 %vm1349_vm0, %v3360_v36  ;;  %2678 = vmatmul.mubr.msk.bf16.vlgmr.msra.gmra.mrb[12].mxu1 %vm1349_vm0, %v3360_v36 }
  0xa5   : > { %1682 = vmatpush1.bf16.msra.mxu0 %v2836_v22  ;;  %1723 = vmatpush1.bf16.msra.mxu1 %v2839_v23  ;;  %v2934_v22 = vld [vmem:[%s3337_s4 + $0x84] ss:$144 sps:$4 sm:$0xff]   ;;  %v2937_v23 = vld [vmem:[%s3337_s4 + $0x8c] ss:$144 sps:$4 sm:$0xff]  }
  0xa6   : > { %1683 = vmatprep.subr.bf16.mxu0 %v2844_v24  ;;  %1724 = vmatprep.subr.bf16.mxu1 %v2847_v25  ;;  %v2932_v24 = vld [vmem:[%s3337_s4 + $0x80] ss:$144 sps:$4 sm:$0xff]   ;;  %v2935_v25 = vld [vmem:[%s3337_s4 + $0x88] ss:$144 sps:$4 sm:$0xff]  }
  0xa7   : > { %1713 = vmatprep.mubr.bf16.mxu0 %v2980_v16  ;;  %1754 = vmatprep.mubr.bf16.mxu1 %v2980_v16 }
  0xa9   : > { %1684 = vmatpush1.bf16.msra.mxu0 %v2842_v26  ;;  %1725 = vmatpush1.bf16.msra.mxu1 %v2845_v27  ;;  %v2940_v26 = vld [vmem:[%s3337_s4 + $0x1a4] ss:$144 sps:$4 sm:$0xff]   ;;  %v2943_v27 = vld [vmem:[%s3337_s4 + $0x1ac] ss:$144 sps:$4 sm:$0xff]  }
  0xaa   : > { %1685 = vmatprep.subr.bf16.mxu0 %v2850_v28  ;;  %1726 = vmatprep.subr.bf16.mxu1 %v2853_v29  ;;  %v2938_v28 = vld [vmem:[%s3337_s4 + $0x1a0] ss:$144 sps:$4 sm:$0xff]   ;;  %v2941_v29 = vld [vmem:[%s3337_s4 + $0x1a8] ss:$144 sps:$4 sm:$0xff]  }
  0xad   : > { %1686 = vmatpush1.bf16.msra.mxu0 %v2848_v30  ;;  %1727 = vmatpush1.bf16.msra.mxu1 %v2851_v31  ;;  %v2946_v30 = vld [vmem:[%s3337_s4 + $0x2c4] ss:$144 sps:$4 sm:$0xff]   ;;  %v2949_v31 = vld [vmem:[%s3337_s4 + $0x2cc] ss:$144 sps:$4 sm:$0xff]  }
  0xae   : > { %1687 = vmatprep.subr.bf16.mxu0 %v2856_v32  ;;  %1728 = vmatprep.subr.bf16.mxu1 %v2859_v33  ;;  %v2944_v32 = vld [vmem:[%s3337_s4 + $0x2c0] ss:$144 sps:$4 sm:$0xff]   ;;  %v2947_v33 = vld [vmem:[%s3337_s4 + $0x2c8] ss:$144 sps:$4 sm:$0xff]  }
  0xb1   : > { %1688 = vmatpush1.bf16.msra.mxu0 %v2854_v34  ;;  %1729 = vmatpush1.bf16.msra.mxu1 %v2857_v35  ;;  %v2952_v34 = vld [vmem:[%s3337_s4 + $0x3e4] ss:$144 sps:$4 sm:$0xff]   ;;  %v2955_v35 = vld [vmem:[%s3337_s4 + $0x3ec] ss:$144 sps:$4 sm:$0xff]  }
  0xb2   : > { %1763 = vmatprep.subr.bf16.mxu0 %v2862_v37  ;;  %1804 = vmatprep.subr.bf16.mxu1 %v2865_v38  ;;  %v2950_v37 = vld [vmem:[%s3337_s4 + $0x3e0] ss:$144 sps:$4 sm:$0xff]   ;;  %v2953_v38 = vld [vmem:[%s3337_s4 + $0x3e8] ss:$144 sps:$4 sm:$0xff]  }
  0xb4   : > { %2679 = vmatmul.mubr.msk.bf16.vlgmr.msra.gmra.mrb[16].mxu0 %vm1349_vm0, %v3360_v36  ;;  %2680 = vmatmul.mubr.msk.bf16.vlgmr.msra.gmra.mrb[16].mxu1 %vm1349_vm0, %v3360_v36 }
  0xb5   : > { %1764 = vmatpush1.bf16.msra.mxu0 %v2860_v39  ;;  %1805 = vmatpush1.bf16.msra.mxu1 %v2863_v40  ;;  %v2981_v39 = vmov 1966171168  }
  0xb6   : > { %1765 = vmatprep.subr.bf16.mxu0 %v2868_v41  ;;  %1806 = vmatprep.subr.bf16.mxu1 %v2871_v42  ;;  %v2240_v40 = vunpack.c.l.s4 %v2981_v39  ;;  %v2242_v41 = vlaneseq }
  0xb7   : > { %1795 = vmatprep.mubr.bf16.mxu0 %v2980_v16  ;;  %1836 = vmatprep.mubr.bf16.mxu1 %v2980_v16 }
  0xb9   : > { %1766 = vmatpush1.bf16.msra.mxu0 %v2866_v43  ;;  %1807 = vmatpush1.bf16.msra.mxu1 %v2869_v44 }
  0xba   : > { %1767 = vmatprep.subr.bf16.mxu0 %v2874_v45  ;;  %1808 = vmatprep.subr.bf16.mxu1 %v2877_v46 }
  0xbd   : > { %1768 = vmatpush1.bf16.msra.mxu0 %v2872_v47  ;;  %1809 = vmatpush1.bf16.msra.mxu1 %v2875_v48 }
  0xbe   : > { %1769 = vmatprep.subr.bf16.mxu0 %v2880_v49  ;;  %1810 = vmatprep.subr.bf16.mxu1 %v2883_v50  ;;  %v2241_v49 = vunpack.c.0.s8 %v2240_v40  ;;  %v2243_v50 = vshrl.u32 %v2242_v41, 7 }
  0xc1   : > { %1770 = vmatpush1.bf16.msra.mxu0 %v2878_v51  ;;  %1811 = vmatpush1.bf16.msra.mxu1 %v2881_v52 }
  0xc2   : > { %1845 = vmatprep.subr.bf16.mxu0 %v2886_v53  ;;  %1886 = vmatprep.subr.bf16.mxu1 %v2889_v54 }
  0xc4   : > { %2681 = vmatmul.mubr.msk.bf16.vlgmr.msra.gmra.mrb[20].mxu0 %vm1349_vm0, %v3360_v36  ;;  %2682 = vmatmul.mubr.msk.bf16.vlgmr.msra.gmra.mrb[20].mxu1 %vm1349_vm0, %v3360_v36 }
  0xc5   : > { %1846 = vmatpush1.bf16.msra.mxu0 %v2884_v55  ;;  %1887 = vmatpush1.bf16.msra.mxu1 %v2887_v56 }
  0xc6   : > { %1847 = vmatprep.subr.bf16.mxu0 %v2892_v57  ;;  %1888 = vmatprep.subr.bf16.mxu1 %v2895_v58 }
  0xc7   : > { %1877 = vmatprep.mubr.bf16.mxu0 %v2980_v16  ;;  %1918 = vmatprep.mubr.bf16.mxu1 %v2980_v16 }
  0xc9   : > { %1848 = vmatpush1.bf16.msra.mxu0 %v2890_v59  ;;  %1889 = vmatpush1.bf16.msra.mxu1 %v2893_v60 }
  0xca   : > { %1849 = vmatprep.subr.bf16.mxu0 %v2898_v61  ;;  %1890 = vmatprep.subr.bf16.mxu1 %v2901_v62  ;;  %v3546_v62 = vsub.s32 %v2241_v49, %v2243_v50 }
  0xcd   : > { %1850 = vmatpush1.bf16.msra.mxu0 %v2896_v63  ;;  %1891 = vmatpush1.bf16.msra.mxu1 %v2899_v0 }
  0xce   : > { %1851 = vmatprep.subr.bf16.mxu0 %v2904_v1  ;;  %1892 = vmatprep.subr.bf16.mxu1 %v2907_v2 }
  0xd1   : > { %1852 = vmatpush1.bf16.msra.mxu0 %v2902_v3  ;;  %1893 = vmatpush1.bf16.msra.mxu1 %v2905_v4 }
  0xd2   : > { %1927 = vmatprep.subr.bf16.mxu0 %v2910_v5  ;;  %1968 = vmatprep.subr.bf16.mxu1 %v2913_v6 }
  0xd4   : > { %2683 = vmatmul.mubr.msk.bf16.vlgmr.msra.gmra.mrb[24].mxu0 %vm1349_vm0, %v3360_v36  ;;  %2684 = vmatmul.mubr.msk.bf16.vlgmr.msra.gmra.mrb[24].mxu1 %vm1349_vm0, %v3360_v36 }
  0xd5   : > { %1928 = vmatpush1.bf16.msra.mxu0 %v2908_v7  ;;  %1969 = vmatpush1.bf16.msra.mxu1 %v2911_v8 }
  0xd6   : > { %1929 = vmatprep.subr.bf16.mxu0 %v2916_v9  ;;  %1970 = vmatprep.subr.bf16.mxu1 %v2919_v10 }
  0xd7   : > { %1959 = vmatprep.mubr.bf16.mxu0 %v2980_v16  ;;  %2000 = vmatprep.mubr.bf16.mxu1 %v2980_v16 }
  0xd9   : > { %1930 = vmatpush1.bf16.msra.mxu0 %v2914_v11  ;;  %1971 = vmatpush1.bf16.msra.mxu1 %v2917_v12 }
  0xda   : > { %1931 = vmatprep.subr.bf16.mxu0 %v2922_v13  ;;  %1972 = vmatprep.subr.bf16.mxu1 %v2925_v14 }
  0xdd   : > { %1932 = vmatpush1.bf16.msra.mxu0 %v2920_v15  ;;  %1973 = vmatpush1.bf16.msra.mxu1 %v2923_v17 }
  0xde   : > { %1933 = vmatprep.subr.bf16.mxu0 %v2928_v18  ;;  %1974 = vmatprep.subr.bf16.mxu1 %v2931_v19 }
  0xe1   : > { %1934 = vmatpush1.bf16.msra.mxu0 %v2926_v20  ;;  %1975 = vmatpush1.bf16.msra.mxu1 %v2929_v21 }
  0xe2   : > { %2009 = vmatprep.subr.bf16.mxu0 %v2934_v22  ;;  %2050 = vmatprep.subr.bf16.mxu1 %v2937_v23 }
  0xe4   : > { %2685 = vmatmul.mubr.msk.bf16.vlgmr.msra.gmra.mrb[28].mxu0 %vm1349_vm0, %v3360_v36  ;;  %2686 = vmatmul.mubr.msk.bf16.vlgmr.msra.gmra.mrb[28].mxu1 %vm1349_vm0, %v3360_v36 }
  0xe5   : > { %2010 = vmatpush1.bf16.msra.mxu0 %v2932_v24  ;;  %2051 = vmatpush1.bf16.msra.mxu1 %v2935_v25 }
  0xe6   : > { %2011 = vmatprep.subr.bf16.mxu0 %v2940_v26  ;;  %2052 = vmatprep.subr.bf16.mxu1 %v2943_v27 }
  0xe7   : > { %2041 = vmatprep.mubr.bf16.mxu0 %v2980_v16  ;;  %2082 = vmatprep.mubr.bf16.mxu1 %v2980_v16  ;;  %v3540_v16 = vpop.permute.xlu0 %626 }
  0xe9   : > { %2012 = vmatpush1.bf16.msra.mxu0 %v2938_v28  ;;  %2053 = vmatpush1.bf16.msra.mxu1 %v2941_v29 }
  0xea   : > { %2013 = vmatprep.subr.bf16.mxu0 %v2946_v30  ;;  %2054 = vmatprep.subr.bf16.mxu1 %v2949_v31 }
  0xed   : > { %2014 = vmatpush1.bf16.msra.mxu0 %v2944_v32  ;;  %2055 = vmatpush1.bf16.msra.mxu1 %v2947_v33 }
  0xee   : > { %2015 = vmatprep.subr.bf16.mxu0 %v2952_v34  ;;  %2056 = vmatprep.subr.bf16.mxu1 %v2955_v35 }
  0xf1   : > { %2016 = vmatpush1.bf16.msra.mxu0 %v2950_v37  ;;  %2057 = vmatpush1.bf16.msra.mxu1 %v2953_v38 }
  0xf4   : > { %2687 = vmatmul.mubr.msk.bf16.vlgmr.msra.gmra.mrb[32].mxu0 %vm1349_vm0, %v3360_v36  ;;  %2688 = vmatmul.mubr.msk.bf16.vlgmr.msra.gmra.mrb[32].mxu1 %vm1349_vm0, %v3360_v36 }
 0x147   : > { %v1387_v42 = vpop.f32.mrb[0].mxu0  ;;  %v1428_v43 = vpop.f32.mrb[0].mxu1 }
 0x148   : > { %v1388_v44 = vadd.f32 %v1387_v42, %v3540_v16  ;;  %v1389_v45 = vpop.f32.mrb[1].mxu0  ;;  %v1429_v46 = vadd.f32 %v1428_v43, %v3540_v16  ;;  %v1430_v47 = vpop.f32.mrb[1].mxu1 }
 0x149   : > { %v1390_v48 = vadd.f32 %v1389_v45, %v3540_v16  ;;  %v1431_v51 = vadd.f32 %v1430_v47, %v3540_v16  ;;  %v1391_v36 = vpop.f32.mrb[2].mxu0  ;;  %v1432_v52 = vpop.f32.mrb[2].mxu1 }
 0x14a   : > { %v2091_v53 = vmax.f32 %v1388_v44, 0.0  ;;  %v2093_v54 = vmax.f32 %v1429_v46, 0.0  ;;  %v1392_v55 = vpop.f32.mrb[3].mxu0  ;;  %v1433_v56 = vpop.f32.mrb[3].mxu1 }
 0x14b   : > { %v2092_v57 = vmax.f32 %v1390_v48, 0.0  ;;  %v2094_v58 = vmax.f32 %v1431_v51, 0.0 }
 0x14c   : > { %v2127_v59 = vmin.f32 %v2091_v53, 6.0  ;;  %v2129_v60 = vmin.f32 %v2093_v54, 6.0 }
 0x14d   : > { %v2128_v61 = vmin.f32 %v2092_v57, 6.0  ;;  %v2130_v63 = vmin.f32 %v2094_v58, 6.0 }
 0x14f   : > { %v2689_v0 = vpack.c.bf16 %v2128_v61, %v2127_v59  ;;  %v2690_v1 = vpack.c.bf16 %v2130_v63, %v2129_v60 }
 0x151   : > { %v2245_v2 = vrot.slane %v2689_v0, %v3546_v62  ;;  %v2252_v3 = vrot.slane %v2690_v1, %v3546_v62 }
 0x153   : > { %v2267_v4 = vcombine.low %v2245_v2, %v2252_v3 }
 0x155   : > { %v2275_v31 = vrot.slane %v2267_v4, %v3546_v62 }
 0x157   : > { %v1469_v5 = vpop.f32.mrb[4].mxu0  ;;  %v1510_v6 = vpop.f32.mrb[4].mxu1 }
 0x158   : > { %v1470_v7 = vadd.f32 %v1469_v5, %v3540_v16  ;;  %v1511_v8 = vadd.f32 %v1510_v6, %v3540_v16  ;;  %v1471_v9 = vpop.f32.mrb[5].mxu0  ;;  %v1512_v10 = vpop.f32.mrb[5].mxu1 }
 0x159   : > { %v1472_v11 = vadd.f32 %v1471_v9, %v3540_v16  ;;  %v1513_v12 = vadd.f32 %v1512_v10, %v3540_v16  ;;  %v1473_v13 = vpop.f32.mrb[6].mxu0  ;;  %v1514_v14 = vpop.f32.mrb[6].mxu1 }
 0x15a   : > { %v2095_v15 = vmax.f32 %v1470_v7, 0.0  ;;  %v2097_v17 = vmax.f32 %v1511_v8, 0.0  ;;  %v1474_v18 = vpop.f32.mrb[7].mxu0  ;;  %v1515_v19 = vpop.f32.mrb[7].mxu1 }
 0x15b   : > { %v2096_v20 = vmax.f32 %v1472_v11, 0.0  ;;  %v2098_v21 = vmax.f32 %v1513_v12, 0.0 }
 0x15c   : > { %v2131_v22 = vmin.f32 %v2095_v15, 6.0  ;;  %v2133_v23 = vmin.f32 %v2097_v17, 6.0 }
 0x15d   : > { %v2132_v24 = vmin.f32 %v2096_v20, 6.0  ;;  %v2134_v25 = vmin.f32 %v2098_v21, 6.0 }
 0x15f   : > { %v2691_v26 = vpack.c.bf16 %v2132_v24, %v2131_v22  ;;  %v2692_v27 = vpack.c.bf16 %v2134_v25, %v2133_v23 }
 0x161   : > { %v2259_v28 = vrot.slane %v2691_v26, %v3546_v62  ;;  %v2266_v29 = vrot.slane %v2692_v27, %v3546_v62 }
 0x163   : > { %v2268_v30 = vcombine.low %v2259_v28, %v2266_v29 }
 0x165   : > { %v2282_v32 = vrot.slane %v2268_v30, %v3546_v62 }
 0x167   : > { %v2283_v33 = vcombine.low %v2275_v31, %v2282_v32  ;;  %v1551_v34 = vpop.f32.mrb[8].mxu0  ;;  %v1592_v35 = vpop.f32.mrb[8].mxu1 }
 0x168   : > { %v1552_v37 = vadd.f32 %v1551_v34, %v3540_v16  ;;  %v1593_v38 = vadd.f32 %v1592_v35, %v3540_v16  ;;  %v1553_v39 = vpop.f32.mrb[9].mxu0  ;;  %v1594_v40 = vpop.f32.mrb[9].mxu1 }
 0x169   : > { %2460 = vst [vmem:[%s3563_s10] sm:$0xff] %v2283_v33  ;;  %v1554_v41 = vadd.f32 %v1553_v39, %v3540_v16  ;;  %v1595_v42 = vadd.f32 %v1594_v40, %v3540_v16  ;;  %v1555_v43 = vpop.f32.mrb[10].mxu0  ;;  %v1596_v44 = vpop.f32.mrb[10].mxu1 }
 0x16a   : > { %v2099_v45 = vmax.f32 %v1552_v37, 0.0  ;;  %v2101_v46 = vmax.f32 %v1593_v38, 0.0  ;;  %v1556_v47 = vpop.f32.mrb[11].mxu0  ;;  %v1597_v48 = vpop.f32.mrb[11].mxu1 }
 0x16b   : > { %v2100_v49 = vmax.f32 %v1554_v41, 0.0  ;;  %v2102_v50 = vmax.f32 %v1595_v42, 0.0 }
 0x16c   : > { %v2135_v51 = vmin.f32 %v2099_v45, 6.0  ;;  %v2137_v36 = vmin.f32 %v2101_v46, 6.0 }
 0x16d   : > { %v2136_v52 = vmin.f32 %v2100_v49, 6.0  ;;  %v2138_v53 = vmin.f32 %v2102_v50, 6.0 }
 0x16f   : > { %v2693_v54 = vpack.c.bf16 %v2136_v52, %v2135_v51  ;;  %v2694_v55 = vpack.c.bf16 %v2138_v53, %v2137_v36 }
 0x171   : > { %v2294_v56 = vrot.slane %v2693_v54, %v3546_v62  ;;  %v2301_v57 = vrot.slane %v2694_v55, %v3546_v62 }
 0x173   : > { %v2316_v58 = vcombine.low %v2294_v56, %v2301_v57 }
 0x175   : > { %v2324_v22 = vrot.slane %v2316_v58, %v3546_v62 }
 0x177   : > { %v1633_v59 = vpop.f32.mrb[12].mxu0  ;;  %v1674_v60 = vpop.f32.mrb[12].mxu1 }
 0x178   : > { %v1634_v61 = vadd.f32 %v1633_v59, %v3540_v16  ;;  %v1675_v63 = vadd.f32 %v1674_v60, %v3540_v16  ;;  %v1635_v0 = vpop.f32.mrb[13].mxu0  ;;  %v1676_v1 = vpop.f32.mrb[13].mxu1 }
 0x179   : > { %v1636_v2 = vadd.f32 %v1635_v0, %v3540_v16  ;;  %v1677_v3 = vadd.f32 %v1676_v1, %v3540_v16  ;;  %v1637_v4 = vpop.f32.mrb[14].mxu0  ;;  %v1678_v5 = vpop.f32.mrb[14].mxu1 }
 0x17a   : > { %v2103_v6 = vmax.f32 %v1634_v61, 0.0  ;;  %v2105_v7 = vmax.f32 %v1675_v63, 0.0  ;;  %v1638_v8 = vpop.f32.mrb[15].mxu0  ;;  %v1679_v9 = vpop.f32.mrb[15].mxu1 }
 0x17b   : > { %v2104_v10 = vmax.f32 %v1636_v2, 0.0  ;;  %v2106_v11 = vmax.f32 %v1677_v3, 0.0 }
 0x17c   : > { %v2139_v12 = vmin.f32 %v2103_v6, 6.0  ;;  %v2141_v13 = vmin.f32 %v2105_v7, 6.0 }
 0x17d   : > { %v2140_v14 = vmin.f32 %v2104_v10, 6.0  ;;  %v2142_v15 = vmin.f32 %v2106_v11, 6.0 }
 0x17f   : > { %v2695_v17 = vpack.c.bf16 %v2140_v14, %v2139_v12  ;;  %v2696_v18 = vpack.c.bf16 %v2142_v15, %v2141_v13 }
 0x181   : > { %v2308_v19 = vrot.slane %v2695_v17, %v3546_v62  ;;  %v2315_v20 = vrot.slane %v2696_v18, %v3546_v62 }
 0x183   : > { %v2317_v21 = vcombine.low %v2308_v19, %v2315_v20 }
 0x185   : > { %v2331_v23 = vrot.slane %v2317_v21, %v3546_v62 }
 0x187   : > { %v2332_v24 = vcombine.low %v2324_v22, %v2331_v23  ;;  %v1715_v25 = vpop.f32.mrb[16].mxu0  ;;  %v1756_v26 = vpop.f32.mrb[16].mxu1 }
 0x188   : > { %v1716_v27 = vadd.f32 %v1715_v25, %v3540_v16  ;;  %v1757_v28 = vadd.f32 %v1756_v26, %v3540_v16  ;;  %v1717_v29 = vpop.f32.mrb[17].mxu0  ;;  %v1758_v30 = vpop.f32.mrb[17].mxu1 }
 0x189   : > { %2461 = vst [vmem:[%s3563_s10 + $0x8] sm:$0xff] %v2332_v24  ;;  %v1718_v31 = vadd.f32 %v1717_v29, %v3540_v16  ;;  %v1759_v32 = vadd.f32 %v1758_v30, %v3540_v16  ;;  %v1719_v33 = vpop.f32.mrb[18].mxu0  ;;  %v1760_v34 = vpop.f32.mrb[18].mxu1 }
 0x18a   : > { %v2107_v35 = vmax.f32 %v1716_v27, 0.0  ;;  %v2109_v37 = vmax.f32 %v1757_v28, 0.0  ;;  %v1720_v38 = vpop.f32.mrb[19].mxu0  ;;  %v1761_v39 = vpop.f32.mrb[19].mxu1 }
 0x18b   : > { %v2108_v40 = vmax.f32 %v1718_v31, 0.0  ;;  %v2110_v41 = vmax.f32 %v1759_v32, 0.0 }
 0x18c   : > { %v2143_v42 = vmin.f32 %v2107_v35, 6.0  ;;  %v2145_v43 = vmin.f32 %v2109_v37, 6.0 }
 0x18d   : > { %v2144_v44 = vmin.f32 %v2108_v40, 6.0  ;;  %v2146_v45 = vmin.f32 %v2110_v41, 6.0 }
 0x18f   : > { %v2697_v46 = vpack.c.bf16 %v2144_v44, %v2143_v42  ;;  %v2698_v47 = vpack.c.bf16 %v2146_v45, %v2145_v43 }
 0x191   : > { %v2343_v48 = vrot.slane %v2697_v46, %v3546_v62  ;;  %v2350_v49 = vrot.slane %v2698_v47, %v3546_v62 }
 0x193   : > { %v2365_v50 = vcombine.low %v2343_v48, %v2350_v49 }
 0x195   : > { %v2373_v12 = vrot.slane %v2365_v50, %v3546_v62 }
 0x197   : > { %v1797_v51 = vpop.f32.mrb[20].mxu0  ;;  %v1838_v36 = vpop.f32.mrb[20].mxu1 }
 0x198   : > { %v1798_v52 = vadd.f32 %v1797_v51, %v3540_v16  ;;  %v1839_v53 = vadd.f32 %v1838_v36, %v3540_v16  ;;  %v1799_v54 = vpop.f32.mrb[21].mxu0  ;;  %v1840_v55 = vpop.f32.mrb[21].mxu1 }
 0x199   : > { %v1800_v56 = vadd.f32 %v1799_v54, %v3540_v16  ;;  %v1841_v57 = vadd.f32 %v1840_v55, %v3540_v16  ;;  %v1801_v58 = vpop.f32.mrb[22].mxu0  ;;  %v1842_v59 = vpop.f32.mrb[22].mxu1 }
 0x19a   : > { %v2111_v60 = vmax.f32 %v1798_v52, 0.0  ;;  %v2113_v61 = vmax.f32 %v1839_v53, 0.0  ;;  %v1802_v63 = vpop.f32.mrb[23].mxu0  ;;  %v1843_v0 = vpop.f32.mrb[23].mxu1 }
 0x19b   : > { %v2112_v1 = vmax.f32 %v1800_v56, 0.0  ;;  %v2114_v2 = vmax.f32 %v1841_v57, 0.0 }
 0x19c   : > { %v2147_v3 = vmin.f32 %v2111_v60, 6.0  ;;  %v2149_v4 = vmin.f32 %v2113_v61, 6.0 }
 0x19d   : > { %v2148_v5 = vmin.f32 %v2112_v1, 6.0  ;;  %v2150_v6 = vmin.f32 %v2114_v2, 6.0 }
 0x19f   : > { %v2699_v7 = vpack.c.bf16 %v2148_v5, %v2147_v3  ;;  %v2700_v8 = vpack.c.bf16 %v2150_v6, %v2149_v4 }
 0x1a1   : > { %v2357_v9 = vrot.slane %v2699_v7, %v3546_v62  ;;  %v2364_v10 = vrot.slane %v2700_v8, %v3546_v62 }
 0x1a3   : > { %v2366_v11 = vcombine.low %v2357_v9, %v2364_v10 }
 0x1a5   : > { %v2380_v13 = vrot.slane %v2366_v11, %v3546_v62 }
 0x1a7   : > { %v2381_v14 = vcombine.low %v2373_v12, %v2380_v13  ;;  %v1879_v15 = vpop.f32.mrb[24].mxu0  ;;  %v1920_v17 = vpop.f32.mrb[24].mxu1 }
 0x1a8   : > { %v1880_v18 = vadd.f32 %v1879_v15, %v3540_v16  ;;  %v1921_v19 = vadd.f32 %v1920_v17, %v3540_v16  ;;  %v1881_v20 = vpop.f32.mrb[25].mxu0  ;;  %v1922_v21 = vpop.f32.mrb[25].mxu1 }
 0x1a9   : > { %2462 = vst [vmem:[%s3563_s10 + $0x10] sm:$0xff] %v2381_v14  ;;  %v1882_v22 = vadd.f32 %v1881_v20, %v3540_v16  ;;  %v1923_v23 = vadd.f32 %v1922_v21, %v3540_v16  ;;  %v1883_v24 = vpop.f32.mrb[26].mxu0  ;;  %v1924_v25 = vpop.f32.mrb[26].mxu1 }
 0x1aa   : > { %v2115_v26 = vmax.f32 %v1880_v18, 0.0  ;;  %v2117_v27 = vmax.f32 %v1921_v19, 0.0  ;;  %v1884_v28 = vpop.f32.mrb[27].mxu0  ;;  %v1925_v29 = vpop.f32.mrb[27].mxu1 }
 0x1ab   : > { %v2116_v30 = vmax.f32 %v1882_v22, 0.0  ;;  %v2118_v31 = vmax.f32 %v1923_v23, 0.0 }
 0x1ac   : > { %v2151_v32 = vmin.f32 %v2115_v26, 6.0  ;;  %v2153_v33 = vmin.f32 %v2117_v27, 6.0 }
 0x1ad   : > { %v2152_v34 = vmin.f32 %v2116_v30, 6.0  ;;  %v2154_v35 = vmin.f32 %v2118_v31, 6.0 }
 0x1af   : > { %v2701_v37 = vpack.c.bf16 %v2152_v34, %v2151_v32  ;;  %v2702_v38 = vpack.c.bf16 %v2154_v35, %v2153_v33 }
 0x1b1   : > { %v2392_v39 = vrot.slane %v2701_v37, %v3546_v62  ;;  %v2399_v40 = vrot.slane %v2702_v38, %v3546_v62 }
 0x1b3   : > { %v2414_v41 = vcombine.low %v2392_v39, %v2399_v40 }
 0x1b5   : > { %v2422_v3 = vrot.slane %v2414_v41, %v3546_v62 }
 0x1b7   : > { %v1961_v42 = vpop.f32.mrb[28].mxu0  ;;  %v2002_v43 = vpop.f32.mrb[28].mxu1 }
 0x1b8   : > { %v1962_v44 = vadd.f32 %v1961_v42, %v3540_v16  ;;  %v2003_v45 = vadd.f32 %v2002_v43, %v3540_v16  ;;  %v1963_v46 = vpop.f32.mrb[29].mxu0  ;;  %v2004_v47 = vpop.f32.mrb[29].mxu1 }
 0x1b9   : > { %v1964_v48 = vadd.f32 %v1963_v46, %v3540_v16  ;;  %v2005_v49 = vadd.f32 %v2004_v47, %v3540_v16  ;;  %v1965_v50 = vpop.f32.mrb[30].mxu0  ;;  %v2006_v51 = vpop.f32.mrb[30].mxu1 }
 0x1ba   : > { %v2119_v36 = vmax.f32 %v1962_v44, 0.0  ;;  %v2121_v52 = vmax.f32 %v2003_v45, 0.0  ;;  %v1966_v53 = vpop.f32.mrb[31].mxu0  ;;  %v2007_v54 = vpop.f32.mrb[31].mxu1 }
 0x1bb   : > { %v2120_v55 = vmax.f32 %v1964_v48, 0.0  ;;  %v2122_v56 = vmax.f32 %v2005_v49, 0.0 }
 0x1bc   : > { %v2155_v57 = vmin.f32 %v2119_v36, 6.0  ;;  %v2157_v58 = vmin.f32 %v2121_v52, 6.0 }
 0x1bd   : > { %v2156_v59 = vmin.f32 %v2120_v55, 6.0  ;;  %v2158_v60 = vmin.f32 %v2122_v56, 6.0 }
 0x1bf   : > { %v2703_v61 = vpack.c.bf16 %v2156_v59, %v2155_v57  ;;  %v2704_v63 = vpack.c.bf16 %v2158_v60, %v2157_v58 }
 0x1c1   : > { %v2406_v0 = vrot.slane %v2703_v61, %v3546_v62  ;;  %v2413_v1 = vrot.slane %v2704_v63, %v3546_v62 }
 0x1c3   : > { %v2415_v2 = vcombine.low %v2406_v0, %v2413_v1 }
 0x1c5   : > { %v2429_v4 = vrot.slane %v2415_v2, %v3546_v62 }
 0x1c7   : > { %v2430_v5 = vcombine.low %v2422_v3, %v2429_v4  ;;  %v2043_v6 = vpop.f32.mrb[32].mxu0  ;;  %v2084_v7 = vpop.f32.mrb[32].mxu1 }
 0x1c8   : > { %v2044_v8 = vadd.f32 %v2043_v6, %v3540_v16  ;;  %v2085_v9 = vadd.f32 %v2084_v7, %v3540_v16  ;;  %v2045_v10 = vpop.f32.mrb[33].mxu0  ;;  %v2086_v11 = vpop.f32.mrb[33].mxu1 }
 0x1c9   : > { %2463 = vst [vmem:[%s3563_s10 + $0x18] sm:$0xff] %v2430_v5  ;;  %v2046_v12 = vadd.f32 %v2045_v10, %v3540_v16  ;;  %v2087_v13 = vadd.f32 %v2086_v11, %v3540_v16  ;;  %v2047_v14 = vpop.f32.mrb[34].mxu0  ;;  %v2088_v15 = vpop.f32.mrb[34].mxu1 }
 0x1ca   : > { %v2123_v17 = vmax.f32 %v2044_v8, 0.0  ;;  %v2125_v18 = vmax.f32 %v2085_v9, 0.0  ;;  %v2048_v19 = vpop.f32.mrb[35].mxu0  ;;  %v2089_v20 = vpop.f32.mrb[35].mxu1 }
 0x1cb   : > { %v2124_v21 = vmax.f32 %v2046_v12, 0.0  ;;  %v2126_v22 = vmax.f32 %v2087_v13, 0.0 }
 0x1cc   : > { %v2159_v23 = vmin.f32 %v2123_v17, 6.0  ;;  %v2161_v24 = vmin.f32 %v2125_v18, 6.0 }
 0x1cd   : > { %v2160_v25 = vmin.f32 %v2124_v21, 6.0  ;;  %v2162_v26 = vmin.f32 %v2126_v22, 6.0 }
 0x1cf   : > { %v2705_v27 = vpack.c.bf16 %v2160_v25, %v2159_v23  ;;  %v2706_v28 = vpack.c.bf16 %v2162_v26, %v2161_v24 }
 0x1d1   : > { %v2439_v29 = vrot.slane %v2705_v27, %v3546_v62  ;;  %v2446_v30 = vrot.slane %v2706_v28, %v3546_v62 }
 0x1d3   : > { %v2447_v16 = vcombine.low %v2439_v29, %v2446_v30 }
 0x1d5   : > { %2707 = vst.sshfl [vmem:[%s3563_s10 + $0x20] sm:$0x55 pattern:$0x73625140] %v2447_v16 }
 0x1d6 PF: > { %p10_p9 = scmp.ge.s32.totalorder %s3019_s16, 4   ;;  %s3632_s12 = smov %s2974_s13 }
 0x1d7   : > { %s3633_s13 = smov %s3028_s19  ;;  %s3634_s14 = smov %s3019_s16 }
 0x1d8   :  { %12 = sbr.rel (!%p10_p9) target bundleno = 2 (0x2), region = 90 }

// kernel: one_hot_sdiff_forward.4
= control target key start
LH: loop header
LB: loop body
LE: loop exit
PB: predicated region body
PF: predicated region fallthrough
CT: control target
= control target key end

     0   :  { %v762_v1 = vmov 0   ;;  %vm278_vm0 = vcmask 1043456   ;;  %vm274_vm1 = vcmask 588800   ;;  %v763_v52 = vmov 0.0   ;;  %s958_s1 = inlined_call_operand.vmem [shape: bf16[72,1122], index: 1, kind: input, shape index: {}]   ;;  %s959_s0 = inlined_call_operand.vmem [shape: bf16[2,72], index: 0, kind: input, shape index: {}]   ;;  %s960_s2 = inlined_call_operand.vmem [shape: f32[2,1], index: 2, kind: input, shape index: {}]   ;;  %s961_s3 = inlined_call_operand.vmem [shape: bf16[2,1122], index: 3, kind: output, shape index: {}]  }
   0x1   :  { %v701_v0 = vld [vmem:[%s958_s1 + $0x4] ss:$36 sps:$4 sm:$0xff]   ;;  %338 = vmatprep.mubr.bf16.mxu0 %v762_v1  ;;  %379 = vmatprep.mubr.bf16.mxu1 %v762_v1  ;;  %v703_v2 = vld [vmem:[%s958_s1 + $0xc] ss:$36 sps:$4 sm:$0xff]   ;;  %v709_v6 = vld [vmem:[%s958_s1 + $0x54] ss:$36 sps:$4 sm:$0xff]   ;;  %v553_v61 = vlaneseq }
   0x2   :  { %700 = vset.pattern.permute.xlu0 %v762_v1  ;;  %306 = vmatprep.subr.bf16.mxu0 %v701_v0  ;;  %v705_v3 = vld [vmem:[%s958_s1] ss:$36 sps:$4 sm:$0xff]   ;;  %v706_v4 = vld [vmem:[%s958_s1 + $0x8] ss:$36 sps:$4 sm:$0xff]   ;;  %v712_v8 = vld [vmem:[%s958_s1 + $0x50] ss:$36 sps:$4 sm:$0xff]  }
   0x3   :  { %347 = vmatprep.subr.bf16.mxu1 %v703_v2  ;;  %v707_v5 = vld [vmem:[%s958_s1 + $0x4c] ss:$36 sps:$4 sm:$0xff]   ;;  %307 = vmatpush1.bf16.msra.mxu0 %v705_v3  ;;  %v713_v9 = vld [vmem:[%s958_s1 + $0x94] ss:$36 sps:$4 sm:$0xff]   ;;  %v715_v10 = vld [vmem:[%s958_s1 + $0x9c] ss:$36 sps:$4 sm:$0xff]  }
   0x4   :  { %348 = vmatpush1.bf16.msra.mxu1 %v706_v4  ;;  %v711_v7 = vld [vmem:[%s958_s1 + $0x48] ss:$36 sps:$4 sm:$0xff]   ;;  %308 = vmatprep.subr.bf16.mxu0 %v707_v5  ;;  %v717_v11 = vld [vmem:[%s958_s1 + $0x90] ss:$36 sps:$4 sm:$0xff]   ;;  %v718_v12 = vld [vmem:[%s958_s1 + $0x98] ss:$36 sps:$4 sm:$0xff]  }
   0x5   :  { %349 = vmatprep.subr.bf16.mxu1 %v709_v6  ;;  %v719_v13 = vld [vmem:[%s958_s1 + $0xdc] ss:$36 sps:$4 sm:$0xff]   ;;  %v721_v14 = vld [vmem:[%s958_s1 + $0xe4] ss:$36 sps:$4 sm:$0xff]   ;;  %v731_v23 = vld [vmem:[%s958_s1 + $0x14] ss:$36 sps:$4 sm:$0xff]  }
   0x6   :  { %v56_v15 = vld [vmem:[%s958_s1 + $0x120] sm:$0xff]  ;;  %v57_v16 = vld [vmem:[%s958_s1 + $0x128] sm:$0xff]  ;;  %v723_v17 = vld [vmem:[%s958_s1 + $0xd8] ss:$36 sps:$4 sm:$0xff]   ;;  %vm764_vm2 = vmmov 0   ;;  %v554_v6 = vshrl.u32 %v553_v61, 7 }
   0x7   :  { %309 = vmatpush1.bf16.msra.mxu0 %v711_v7  ;;  %v724_v18 = vld [vmem:[%s958_s1 + $0xe0] ss:$36 sps:$4 sm:$0xff]   ;;  %v655_v19 = vcombine.high %v56_v15, %v56_v15  ;;  %v657_v20 = vcombine.high %v57_v16, %v57_v16  ;;  %v654_v21 = vcombine.low %v56_v15, %v56_v15  ;;  %v656_v22 = vcombine.low %v57_v16, %v57_v16  ;;  %v729_v28 = vld [vmem:[%s958_s1 + $0x10] ss:$36 sps:$4 sm:$0xff]   ;;  %v732_v29 = vld [vmem:[%s958_s1 + $0x18] ss:$36 sps:$4 sm:$0xff]  }
   0x8   :  { %350 = vmatpush1.bf16.msra.mxu1 %v712_v8  ;;  %310 = vmatprep.subr.bf16.mxu0 %v713_v9  ;;  %v734_v26 = vld [vmem:[%s958_s1 + $0x1c] ss:$36 sps:$4 sm:$0xff]   ;;  %v740_v31 = vld [vmem:[%s958_s1 + $0x64] ss:$36 sps:$4 sm:$0xff]   ;;  %v746_v35 = vld [vmem:[%s958_s1 + $0xac] ss:$36 sps:$4 sm:$0xff]  }
   0x9   :  { %351 = vmatprep.subr.bf16.mxu1 %v715_v10  ;;  %v280_v24 = vsel %vm278_vm0, %v654_v21, 0  ;;  %v286_v25 = vsel %vm278_vm0, %v656_v22, 0  ;;  %v856_v27 = vld [vmem:[%s959_s0] sm:$0x1]  ;;  %v735_v32 = vld [vmem:[%s958_s1 + $0x58] ss:$36 sps:$4 sm:$0xff]  }
   0xa   :  { %v737_v30 = vld [vmem:[%s958_s1 + $0x5c] ss:$36 sps:$4 sm:$0xff]   ;;  %v743_v34 = vld [vmem:[%s958_s1 + $0xa4] ss:$36 sps:$4 sm:$0xff]   ;;  %v749_v39 = vld [vmem:[%s958_s1 + $0xec] ss:$36 sps:$4 sm:$0xff]  }
   0xb   :  { %311 = vmatpush1.bf16.msra.mxu0 %v717_v11  ;;  %v738_v33 = vld [vmem:[%s958_s1 + $0x60] ss:$36 sps:$4 sm:$0xff]   ;;  %v744_v37 = vld [vmem:[%s958_s1 + $0xa8] ss:$36 sps:$4 sm:$0xff]   ;;  %v752_v40 = vld [vmem:[%s958_s1 + $0xf4] ss:$36 sps:$4 sm:$0xff]  }
   0xc   :  { %352 = vmatpush1.bf16.msra.mxu1 %v718_v12  ;;  %312 = vmatprep.subr.bf16.mxu0 %v719_v13  ;;  %v741_v36 = vld [vmem:[%s958_s1 + $0xa0] ss:$36 sps:$4 sm:$0xff]   ;;  %v58_v41 = vld [vmem:[%s958_s1 + $0x130] sm:$0xff]  ;;  %v59_v42 = vld [vmem:[%s958_s1 + $0x138] sm:$0xff]  ;;  %v765_v59 = vmov 1966171168  }
   0xd   :  { %353 = vmatprep.subr.bf16.mxu1 %v721_v14  ;;  %v61_v38 = vld [vmem:[%s960_s2] sm:$0x3]  ;;  %v747_v43 = vld [vmem:[%s958_s1 + $0xe8] ss:$36 sps:$4 sm:$0xff]   ;;  %v750_v44 = vld [vmem:[%s958_s1 + $0xf0] ss:$36 sps:$4 sm:$0xff]   ;;  %v659_v45 = vcombine.high %v58_v41, %v58_v41  ;;  %v661_v46 = vcombine.high %v59_v42, %v59_v42  ;;  %v658_v47 = vcombine.low %v58_v41, %v58_v41  ;;  %v660_v48 = vcombine.low %v59_v42, %v59_v42 }
   0xe   :  { %64 = vperm.xlu0 %700, %v61_v38   ;;  %v757_v51 = vld [vmem:[%s958_s1 + $0x20] ss:$36 sps:$4 sm:$0xff]   ;;  %v758_v53 = vld [vmem:[%s958_s1 + $0x68] ss:$36 sps:$4 sm:$0xff]   ;;  %v759_v54 = vld [vmem:[%s958_s1 + $0xb0] ss:$36 sps:$4 sm:$0xff]   ;;  %v551_v60 = vunpack.c.l.s4 %v765_v59 }
   0xf   :  { %313 = vmatpush1.bf16.msra.mxu0 %v723_v17  ;;  %v292_v49 = vsel %vm278_vm0, %v658_v47, 0  ;;  %v298_v50 = vsel %vm278_vm0, %v660_v48, 0  ;;  %v760_v55 = vld [vmem:[%s958_s1 + $0xf8] ss:$36 sps:$4 sm:$0xff]   ;;  %v761_v56 = vld [vmem:[%s958_s1 + $0x140] ss:$0 sps:$4 sm:$0xff]  }
  0x10   :  { %354 = vmatpush1.bf16.msra.mxu1 %v724_v18  ;;  %663 = vmatprep.subr.msk.bf16.mxu0 %vm278_vm0, %v655_v19  ;;  %v304_v57 = vsel %vm278_vm0, %v761_v56, 0  ;;  %v552_v5 = vunpack.c.0.s8 %v551_v60  ;;  %vm612_vm3 = vcmask 794624  }
  0x11   :  { %665 = vmatprep.subr.msk.bf16.mxu1 %vm278_vm0, %v657_v20 }
  0x12   :  { %v555_v19 = vsub.s32 %v552_v5, %v554_v6 }
  0x13   :  { %315 = vmatpush1.bf16.msra.mxu0 %v280_v24 }
  0x14   :  { %356 = vmatpush1.bf16.msra.mxu1 %v286_v25  ;;  %388 = vmatprep.subr.bf16.mxu0 %v731_v23 }
  0x15   :  { %429 = vmatprep.subr.bf16.mxu1 %v734_v26 }
  0x16   :  { %664 = vmatmul.mubr.msk.bf16.vlgmr.msra.gmra.mrb[0].mxu0 %vm274_vm1, %v856_v27 }
  0x17   :  { %666 = vmatmul.mubr.msk.bf16.vlgmr.msra.gmra.mrb[0].mxu1 %vm274_vm1, %v856_v27  ;;  %389 = vmatpush1.bf16.msra.mxu0 %v729_v28 }
  0x18   :  { %430 = vmatpush1.bf16.msra.mxu1 %v732_v29  ;;  %390 = vmatprep.subr.bf16.mxu0 %v737_v30 }
  0x19   :  { %431 = vmatprep.subr.bf16.mxu1 %v740_v31  ;;  %420 = vmatprep.mubr.bf16.mxu0 %v762_v1 }
  0x1a   :  { %461 = vmatprep.mubr.bf16.mxu1 %v762_v1 }
  0x1b   :  { %391 = vmatpush1.bf16.msra.mxu0 %v735_v32 }
  0x1c   :  { %432 = vmatpush1.bf16.msra.mxu1 %v738_v33  ;;  %392 = vmatprep.subr.bf16.mxu0 %v743_v34 }
  0x1d   :  { %433 = vmatprep.subr.bf16.mxu1 %v746_v35 }
  0x1f   :  { %393 = vmatpush1.bf16.msra.mxu0 %v741_v36 }
  0x20   :  { %434 = vmatpush1.bf16.msra.mxu1 %v744_v37  ;;  %394 = vmatprep.subr.bf16.mxu0 %v749_v39 }
  0x21   :  { %435 = vmatprep.subr.bf16.mxu1 %v752_v40 }
  0x23   :  { %395 = vmatpush1.bf16.msra.mxu0 %v747_v43 }
  0x24   :  { %436 = vmatpush1.bf16.msra.mxu1 %v750_v44  ;;  %667 = vmatprep.subr.msk.bf16.mxu0 %vm278_vm0, %v659_v45 }
  0x25   :  { %669 = vmatprep.subr.msk.bf16.mxu1 %vm278_vm0, %v661_v46 }
  0x27   :  { %397 = vmatpush1.bf16.msra.mxu0 %v292_v49 }
  0x28   :  { %438 = vmatpush1.bf16.msra.mxu1 %v298_v50  ;;  %682 = vmatprep.subr.bf16.mxu0 %v763_v52 }
  0x2a   :  { %668 = vmatmul.mubr.msk.bf16.vlgmr.msra.gmra.mrb[4].mxu0 %vm274_vm1, %v856_v27 }
  0x2b   :  { %670 = vmatmul.mubr.msk.bf16.vlgmr.msra.gmra.mrb[4].mxu1 %vm274_vm1, %v856_v27  ;;  %683 = vmatpush3.bf16.msra.mxu0 %v757_v51 }
  0x2c   :  { %692 = vmatprep.mubr.msk.bf16.mxu0 %vm764_vm2, %v763_v52  ;;  %684 = vmatprep.subr.bf16.mxu0 %v763_v52 }
  0x2f   :  { %685 = vmatpush3.bf16.msra.mxu0 %v758_v53 }
  0x30   :  { %686 = vmatprep.subr.bf16.mxu0 %v763_v52 }
  0x33   :  { %687 = vmatpush3.bf16.msra.mxu0 %v759_v54 }
  0x34   :  { %688 = vmatprep.subr.bf16.mxu0 %v763_v52 }
  0x37   :  { %689 = vmatpush3.bf16.msra.mxu0 %v760_v55 }
  0x38   :  { %690 = vmatprep.subr.bf16.mxu0 %v763_v52 }
  0x3b   :  { %691 = vmatpush3.bf16.msra.mxu0 %v304_v57 }
  0x3e   :  { %693 = vmatmul.mubr.msk.bf16.vlgmr.msra.gmra.mrb[8].mxu0 %vm274_vm1, %v856_v27 }
  0x8d   :  { %v941_v58 = vpop.permute.xlu0 %64 }
  0xe9   :  { %v340_v62 = vpop.f32.mrb[0].mxu0 }
  0xea   :  { %v381_v63 = vpop.f32.mrb[0].mxu1  ;;  %v341_v0 = vadd.f32 %v340_v62, %v941_v58  ;;  %v342_v1 = vpop.f32.mrb[1].mxu0 }
  0xeb   :  { %v382_v2 = vadd.f32 %v381_v63, %v941_v58  ;;  %v383_v3 = vpop.f32.mrb[1].mxu1  ;;  %v343_v4 = vadd.f32 %v342_v1, %v941_v58  ;;  %v344_v8 = vpop.f32.mrb[2].mxu0 }
  0xec   :  { %v384_v7 = vadd.f32 %v383_v3, %v941_v58  ;;  %v385_v9 = vpop.f32.mrb[2].mxu1  ;;  %v510_v10 = vmax.f32 %v341_v0, 0.0  ;;  %v345_v12 = vpop.f32.mrb[3].mxu0 }
  0xed   :  { %v512_v11 = vmax.f32 %v382_v2, 0.0  ;;  %v386_v13 = vpop.f32.mrb[3].mxu1  ;;  %v511_v14 = vmax.f32 %v343_v4, 0.0 }
  0xee   :  { %v513_v15 = vmax.f32 %v384_v7, 0.0  ;;  %v519_v16 = vmin.f32 %v510_v10, 6.0 }
  0xef   :  { %v521_v17 = vmin.f32 %v512_v11, 6.0  ;;  %v520_v18 = vmin.f32 %v511_v14, 6.0 }
  0xf0   :  { %v522_v20 = vmin.f32 %v513_v15, 6.0 }
  0xf1   :  { %v672_v21 = vpack.c.bf16 %v520_v18, %v519_v16 }
  0xf2   :  { %v673_v22 = vpack.c.bf16 %v522_v20, %v521_v17 }
  0xf3   :  { %v556_v23 = vrot.slane %v672_v21, %v555_v19 }
  0xf4   :  { %v563_v24 = vrot.slane %v673_v22, %v555_v19 }
  0xf6   :  { %v578_v25 = vcombine.low %v556_v23, %v563_v24 }
  0xf8   :  { %v586_v51 = vrot.slane %v578_v25, %v555_v19 }
  0xfd   :  { %v422_v26 = vpop.f32.mrb[4].mxu0 }
  0xfe   :  { %v463_v27 = vpop.f32.mrb[4].mxu1  ;;  %v423_v28 = vadd.f32 %v422_v26, %v941_v58  ;;  %v424_v30 = vpop.f32.mrb[5].mxu0 }
  0xff   :  { %v464_v29 = vadd.f32 %v463_v27, %v941_v58  ;;  %v465_v31 = vpop.f32.mrb[5].mxu1  ;;  %v425_v32 = vadd.f32 %v424_v30, %v941_v58  ;;  %v426_v34 = vpop.f32.mrb[6].mxu0 }
 0x100   :  { %v466_v33 = vadd.f32 %v465_v31, %v941_v58  ;;  %v467_v35 = vpop.f32.mrb[6].mxu1  ;;  %v514_v36 = vmax.f32 %v423_v28, 0.0  ;;  %v427_v38 = vpop.f32.mrb[7].mxu0 }
 0x101   :  { %v516_v37 = vmax.f32 %v464_v29, 0.0  ;;  %v468_v39 = vpop.f32.mrb[7].mxu1  ;;  %v515_v40 = vmax.f32 %v425_v32, 0.0 }
 0x102   :  { %v517_v41 = vmax.f32 %v466_v33, 0.0  ;;  %v523_v42 = vmin.f32 %v514_v36, 6.0 }
 0x103   :  { %v525_v43 = vmin.f32 %v516_v37, 6.0  ;;  %v524_v44 = vmin.f32 %v515_v40, 6.0 }
 0x104   :  { %v526_v45 = vmin.f32 %v517_v41, 6.0 }
 0x105   :  { %v674_v46 = vpack.c.bf16 %v524_v44, %v523_v42 }
 0x106   :  { %v675_v47 = vpack.c.bf16 %v526_v45, %v525_v43 }
 0x107   :  { %v570_v48 = vrot.slane %v674_v46, %v555_v19 }
 0x108   :  { %v577_v49 = vrot.slane %v675_v47, %v555_v19 }
 0x10a   :  { %v579_v50 = vcombine.low %v570_v48, %v577_v49 }
 0x10c   :  { %v593_v52 = vrot.slane %v579_v50, %v555_v19 }
 0x10e   :  { %v594_v53 = vcombine.low %v586_v51, %v593_v52 }
 0x110   :  { %611 = vst [vmem:[%s961_s3] sm:$0xff] %v594_v53 }
 0x111   :  { %v504_v54 = vpop.f32.mrb[8].mxu0 }
 0x112   :  { %v505_v55 = vadd.f32 %v504_v54, %v941_v58  ;;  %v694_v56 = vpop.f32.mrb[9].mxu0 }
 0x113   :  { %v507_v57 = vpop.f32.mrb[10].mxu0 }
 0x114   :  { %v518_v59 = vmax.f32 %v505_v55, 0.0  ;;  %v695_v60 = vpop.f32.mrb[11].mxu0 }
 0x116   :  { %v527_v61 = vmin.f32 %v518_v59, 6.0 }
 0x118   :  { %v536_v62 = vpack.c.bf16 %v527_v61, %v527_v61 }
 0x11a   :  { %v601_v63 = vrot.slane %v536_v62, %v555_v19 }
 0x11c   :  { %v608_v0 = vrot.slane %v601_v63, %v555_v19 }
 0x11e   :  { %613 = vst.msk [vmem:[%s961_s3 + $0x8] sm:$0x1] %vm612_vm3, %v608_v0 }

// kernel: one_hot_sdiff_forward.5
= control target key start
LH: loop header
LB: loop body
LE: loop exit
PB: predicated region body
PF: predicated region fallthrough
CT: control target
= control target key end

     0   :  { %v2036_v1 = vmov 0   ;;  %v2037_v23 = vmov 1983009808   ;;  %v90_v25 = vlaneseq  ;;  %vm253_vm0 = vcmask 64512   ;;  %s2482_s0 = inlined_call_operand.vmem [shape: bf16[2,392,80], index: 0, kind: input, shape index: {}]   ;;  %s2483_s1 = inlined_call_operand.vmem [shape: bf16[4,392], index: 1, kind: input, shape index: {}]   ;;  %s2484_s2 = inlined_call_operand.vmem [shape: f32[4,1], index: 2, kind: input, shape index: {}]   ;;  %s2485_s3 = inlined_call_operand.vmem [shape: f32[4,80,80], index: 3, kind: input, shape index: {}]   ;;  %s2486_s6 = inlined_call_operand.<no memory space> [shape: f32[1,1], index: 6, kind: input, shape index: {}]   ;;  %s2487_s4 = inlined_call_operand.vmem [shape: f32[1,80], index: 4, kind: input, shape index: {}]   ;;  %s2488_s5 = inlined_call_operand.vmem [shape: f32[1,80], index: 5, kind: input, shape index: {}]   ;;  %s2489_s7 = inlined_call_operand.vmem [shape: f32[2,1], index: 7, kind: output, shape index: {}]  }
   0x1   :  { %v1985_v0 = vld [vmem:[%s2482_s0 + $0x40] sm:$0xff]   ;;  %1984 = vset.pattern.permute.xlu0 %v2036_v1  ;;  %v1989_v5 = vld [vmem:[%s2482_s0 + $0x48] sm:$0xff]   ;;  %v1993_v9 = vld [vmem:[%s2482_s0 + $0x50] sm:$0xff]   ;;  %v88_v24 = vunpack.c.l.s4 %v2037_v23  ;;  %vm257_vm1 = vcmask 1043456   ;;  %vm2039_vm2 = vmmov 0   ;;  %vm354_vm3 = vcmask 654336  }
   0x2   :  { %v1986_v2 = vld [vmem:[%s2482_s0 + $0x104] sm:$0xff]   ;;  %1529 = vmatprep.subr.bf16.mxu0 %v1985_v0  ;;  %v1990_v6 = vld [vmem:[%s2482_s0 + $0x10c] sm:$0xff]   ;;  %v1994_v10 = vld [vmem:[%s2482_s0 + $0x114] sm:$0xff]   ;;  %v91_v31 = vshrl.u32 %v90_v25, 7  ;;  %vm688_vm4 = vcmask 647168   ;;  %vm694_vm5 = vcmask 0  }
   0x3   :  { %v1987_v3 = vld [vmem:[%s2482_s0] sm:$0xff]   ;;  %1595 = vmatprep.subr.bf16.mxu1 %v1986_v2  ;;  %v1991_v7 = vld [vmem:[%s2482_s0 + $0x8] sm:$0xff]   ;;  %v1995_v11 = vld [vmem:[%s2482_s0 + $0x10] sm:$0xff]   ;;  %v89_v30 = vunpack.c.0.s8 %v88_v24 }
   0x4   :  { %v1988_v4 = vld [vmem:[%s2482_s0 + $0xc4] sm:$0xff]   ;;  %1530 = vmatpush3.bf16.msra.mxu0 %v1987_v3  ;;  %v1992_v8 = vld [vmem:[%s2482_s0 + $0xcc] sm:$0xff]   ;;  %v1996_v12 = vld [vmem:[%s2482_s0 + $0xd4] sm:$0xff]  }
   0x5   :  { %1596 = vmatpush3.bf16.msra.mxu1 %v1988_v4  ;;  %1531 = vmatprep.subr.bf16.mxu0 %v1989_v5  ;;  %v1997_v13 = vld [vmem:[%s2482_s0 + $0x58] sm:$0xff]   ;;  %v2001_v17 = vld [vmem:[%s2482_s0 + $0x60] sm:$0xff]   ;;  %v2005_v21 = vld [vmem:[%s2482_s0 + $0x68] sm:$0xff]   ;;  %v92_v36 = vsub.s32 %v89_v30, %v91_v31  ;;  %v2038_v4 = vmov 0.0|0.0  }
   0x6   :  { %1597 = vmatprep.subr.bf16.mxu1 %v1990_v6  ;;  %v1998_v14 = vld [vmem:[%s2482_s0 + $0x11c] sm:$0xff]   ;;  %v2002_v18 = vld [vmem:[%s2482_s0 + $0x124] sm:$0xff]   ;;  %v2006_v22 = vld [vmem:[%s2482_s0 + $0x12c] sm:$0xff]  }
   0x7   :  { %v1999_v15 = vld [vmem:[%s2482_s0 + $0x18] sm:$0xff]   ;;  %v2003_v19 = vld [vmem:[%s2482_s0 + $0x20] sm:$0xff]   ;;  %v2007_v26 = vld [vmem:[%s2482_s0 + $0x28] sm:$0xff]  }
   0x8   :  { %1532 = vmatpush3.bf16.msra.mxu0 %v1991_v7  ;;  %v2000_v16 = vld [vmem:[%s2482_s0 + $0xdc] sm:$0xff]   ;;  %v2004_v20 = vld [vmem:[%s2482_s0 + $0xe4] sm:$0xff]   ;;  %v2008_v27 = vld [vmem:[%s2482_s0 + $0xec] sm:$0xff]  }
   0x9   :  { %1598 = vmatpush3.bf16.msra.mxu1 %v1992_v8  ;;  %1533 = vmatprep.subr.bf16.mxu0 %v1993_v9  ;;  %v2009_v28 = vld [vmem:[%s2482_s0 + $0x70] sm:$0xff]   ;;  %v2013_v34 = vld [vmem:[%s2482_s0 + $0x78] sm:$0xff]   ;;  %v29_v39 = vld [vmem:[%s2483_s1] sm:$0xff] }
   0xa   :  { %1599 = vmatprep.subr.bf16.mxu1 %v1994_v10  ;;  %v2010_v29 = vld [vmem:[%s2482_s0 + $0x134] sm:$0xff]   ;;  %v2014_v35 = vld [vmem:[%s2482_s0 + $0x13c] sm:$0xff]   ;;  %v86_v40 = vcombine.high %v29_v39, %v29_v39  ;;  %v93_v41 = vrot.slane %v29_v39, %v92_v36  ;;  %v2019_v45 = vld [vmem:[%s2482_s0 + $0x144] sm:$0xff]  }
   0xb   :  { %v2011_v32 = vld [vmem:[%s2482_s0 + $0x30] sm:$0xff]   ;;  %v2015_v37 = vld [vmem:[%s2482_s0 + $0x38] sm:$0xff]   ;;  %v2018_v42 = vld [vmem:[%s2482_s0 + $0x80] sm:$0xff]  }
   0xc   :  { %1534 = vmatpush3.bf16.msra.mxu0 %v1995_v11  ;;  %v2012_v33 = vld [vmem:[%s2482_s0 + $0xf4] sm:$0xff]   ;;  %v2016_v38 = vld [vmem:[%s2482_s0 + $0xfc] sm:$0xff]   ;;  %v2186_v43 = vrot.slane %v86_v40, %v92_v36  ;;  %v101_v44 = vcombine.high %v93_v41, %v93_v41  ;;  %v2020_v47 = vld [vmem:[%s2482_s0 + $0x88] sm:$0xff]  }
   0xd   :  { %1600 = vmatpush3.bf16.msra.mxu1 %v1996_v12  ;;  %1535 = vmatprep.subr.bf16.mxu0 %v1997_v13  ;;  %v2021_v48 = vld [vmem:[%s2482_s0 + $0x14c] sm:$0xff]   ;;  %v2023_v50 = vld [vmem:[%s2482_s0 + $0x154] sm:$0xff]   ;;  %v2025_v52 = vld [vmem:[%s2482_s0 + $0x15c] sm:$0xff]  }
   0xe   :  { %1601 = vmatprep.subr.bf16.mxu1 %v1998_v14  ;;  %293 = vmatprep.mubr.bf16.mxu0 %v101_v44  ;;  %v102_v46 = vcombine.high %v2186_v43, %v2186_v43  ;;  %v2022_v49 = vld [vmem:[%s2482_s0 + $0x90] sm:$0xff]   ;;  %v2024_v51 = vld [vmem:[%s2482_s0 + $0x98] sm:$0xff]   ;;  %v79_v53 = vld [vmem:[%s2484_s2] sm:$0xf] }
   0xf   :  { %959 = vmatprep.mubr.bf16.mxu1 %v101_v44  ;;  %82 = vperm.xlu0 %1984, %v79_v53   ;;  %v2026_v54 = vld [vmem:[%s2482_s0 + $0xa0] sm:$0xff]   ;;  %v2028_v57 = vld [vmem:[%s2482_s0 + $0xa8] sm:$0xff]   ;;  %v2030_v59 = vld [vmem:[%s2482_s0 + $0xb0] sm:$0xff]  }
  0x10   :  { %1536 = vmatpush3.bf16.msra.mxu0 %v1999_v15  ;;  %v2027_v55 = vld [vmem:[%s2482_s0 + $0x164] sm:$0xff]   ;;  %v747_v56 = vld [vmem:[%s2484_s2] sm:$0xf]  ;;  %v2029_v58 = vld [vmem:[%s2482_s0 + $0x16c] sm:$0xff]  }
  0x11   :  { %1602 = vmatpush3.bf16.msra.mxu1 %v2000_v16  ;;  %1537 = vmatprep.subr.bf16.mxu0 %v2001_v17  ;;  %v2031_v60 = vld [vmem:[%s2482_s0 + $0x174] sm:$0xff]   ;;  %v2033_v62 = vld [vmem:[%s2482_s0 + $0x17c] sm:$0xff]   ;;  %v2035_v0 = vld [vmem:[%s2482_s0 + $0x184] ss:$0 sps:$4 sm:$0xff]  }
  0x12   :  { %1603 = vmatprep.subr.bf16.mxu1 %v2002_v18  ;;  %v2032_v61 = vld [vmem:[%s2482_s0 + $0xb8] sm:$0xff]   ;;  %v2034_v63 = vld [vmem:[%s2482_s0 + $0xc0] ss:$0 sps:$4 sm:$0xff]   ;;  %v925_v3 = vsel %vm257_vm1, %v2035_v0, 0  ;;  %v346_v6 = vld [vmem:[%s2485_s3 + $0x10] sm:$0xff] }
  0x13   :  { %750 = vperm.xlu0 %1984, %v747_v56   ;;  %v259_v2 = vsel %vm257_vm1, %v2034_v63, 0  ;;  %v344_v5 = vld [vmem:[%s2485_s3] sm:$0xff]  ;;  %v347_v8 = vld [vmem:[%s2485_s3 + $0x18] sm:$0xff]  ;;  %v349_v11 = vld [vmem:[%s2485_s3 + $0x28] sm:$0xff] }
  0x14   :  { %1538 = vmatpush3.bf16.msra.mxu0 %v2003_v19  ;;  %v1849_v9 = vpack.c.bf16 %v347_v8, %v346_v6  ;;  %v348_v10 = vld [vmem:[%s2485_s3 + $0x20] sm:$0xff]  ;;  %v350_v13 = vld [vmem:[%s2485_s3 + $0x30] sm:$0xff]  ;;  %v351_v14 = vld [vmem:[%s2485_s3 + $0x38] sm:$0xff]  ;;  %v2040_v19 = vmov 0.0  }
  0x15   :  { %1604 = vmatpush3.bf16.msra.mxu1 %v2004_v20  ;;  %1539 = vmatprep.subr.bf16.mxu0 %v2005_v21  ;;  %v1852_v12 = vpack.c.bf16 %v349_v11, %v348_v10  ;;  %v1855_v15 = vpack.c.bf16 %v351_v14, %v350_v13  ;;  %v352_v16 = vld [vmem:[%s2485_s3 + $0x40] sm:$0xff]  ;;  %v353_v17 = vld [vmem:[%s2485_s3 + $0x48] sm:$0xff]  ;;  %v1387_v40 = vld [vmem:[%s2485_s3 + $0x50] sm:$0xff] }
  0x16   :  { %1605 = vmatprep.subr.bf16.mxu1 %v2006_v22  ;;  %v1858_v18 = vpack.c.bf16 %v353_v17, %v352_v16  ;;  %v1398_v63 = vld [vmem:[%s2485_s3 + $0xa0] sm:$0xff]  ;;  %v1399_v0 = vld [vmem:[%s2485_s3 + $0xa8] sm:$0xff]  ;;  %v1401_v6 = vld [vmem:[%s2485_s3 + $0xb8] sm:$0xff] }
  0x17   :  { %v1402_v8 = vld [vmem:[%s2485_s3 + $0xc0] sm:$0xff]  ;;  %v1404_v11 = vld [vmem:[%s2485_s3 + $0xd0] sm:$0xff] }
  0x18   :  { %1540 = vmatpush3.bf16.msra.mxu0 %v2007_v26  ;;  %v1406_v14 = vld [vmem:[%s2485_s3 + $0xe0] sm:$0xff]  ;;  %v1409_v17 = vld [vmem:[%s2485_s3 + $0xf0] sm:$0xff] }
  0x19   :  { %1606 = vmatpush3.bf16.msra.mxu1 %v2008_v27  ;;  %1541 = vmatprep.subr.bf16.mxu0 %v2009_v28 }
  0x1a   :  { %1607 = vmatprep.subr.bf16.mxu1 %v2010_v29 }
  0x1c   :  { %1542 = vmatpush3.bf16.msra.mxu0 %v2011_v32 }
  0x1d   :  { %1608 = vmatpush3.bf16.msra.mxu1 %v2012_v33  ;;  %1543 = vmatprep.subr.bf16.mxu0 %v2013_v34 }
  0x1e   :  { %1609 = vmatprep.subr.bf16.mxu1 %v2014_v35 }
  0x20   :  { %1544 = vmatpush3.bf16.msra.mxu0 %v2015_v37 }
  0x21   :  { %1610 = vmatpush3.bf16.msra.mxu1 %v2016_v38  ;;  %301 = vmatprep.subr.bf16.mxu0 %v2036_v1 }
  0x22   :  { %967 = vmatprep.subr.bf16.mxu1 %v2036_v1 }
  0x23   :  { %294 = vmatmul.mubr.bf16.vlgmr.msra.gmra.mrb[0].mxu0 %v93_v41 }
  0x24   :  { %960 = vmatmul.mubr.bf16.vlgmr.msra.gmra.mrb[0].mxu1 %v93_v41  ;;  %302 = vmatpush1.bf16.msra.mxu0 %v2018_v42  ;;  %v1388_v41 = vld [vmem:[%s2485_s3 + $0x58] sm:$0xff] }
  0x25   :  { %968 = vmatpush1.bf16.msra.mxu1 %v2019_v45  ;;  %303 = vmatprep.subr.bf16.mxu0 %v2036_v1 }
  0x26   :  { %969 = vmatprep.subr.bf16.mxu1 %v2036_v1  ;;  %1385 = vmatprep.mubr.msk.bf16.mxu0 %vm253_vm0, %v102_v46 }
  0x27   :  { %1494 = vmatprep.mubr.msk.bf16.mxu1 %vm253_vm0, %v102_v46 }
  0x28   :  { %304 = vmatpush1.bf16.msra.mxu0 %v2020_v47 }
  0x29   :  { %970 = vmatpush1.bf16.msra.mxu1 %v2021_v48  ;;  %305 = vmatprep.subr.bf16.mxu0 %v2036_v1  ;;  %v1861_v48 = vpack.c.bf16 %v1388_v41, %v1387_v40 }
  0x2a   :  { %971 = vmatprep.subr.bf16.mxu1 %v2036_v1 }
  0x2c   :  { %306 = vmatpush1.bf16.msra.mxu0 %v2022_v49 }
  0x2d   :  { %972 = vmatpush1.bf16.msra.mxu1 %v2023_v50  ;;  %307 = vmatprep.subr.bf16.mxu0 %v2036_v1 }
  0x2e   :  { %973 = vmatprep.subr.bf16.mxu1 %v2036_v1 }
  0x30   :  { %308 = vmatpush1.bf16.msra.mxu0 %v2024_v51  ;;  %v1389_v51 = vld [vmem:[%s2485_s3 + $0x60] sm:$0xff] }
  0x31   :  { %974 = vmatpush1.bf16.msra.mxu1 %v2025_v52  ;;  %309 = vmatprep.subr.bf16.mxu0 %v2036_v1  ;;  %v1390_v52 = vld [vmem:[%s2485_s3 + $0x68] sm:$0xff] }
  0x32   :  { %975 = vmatprep.subr.bf16.mxu1 %v2036_v1  ;;  %v1864_v53 = vpack.c.bf16 %v1390_v52, %v1389_v51 }
  0x34   :  { %310 = vmatpush1.bf16.msra.mxu0 %v2026_v54  ;;  %v1391_v54 = vld [vmem:[%s2485_s3 + $0x70] sm:$0xff] }
  0x35   :  { %976 = vmatpush1.bf16.msra.mxu1 %v2027_v55  ;;  %311 = vmatprep.subr.bf16.mxu0 %v2036_v1  ;;  %v1392_v55 = vld [vmem:[%s2485_s3 + $0x78] sm:$0xff] }
  0x36   :  { %977 = vmatprep.subr.bf16.mxu1 %v2036_v1  ;;  %v1867_v56 = vpack.c.bf16 %v1392_v55, %v1391_v54 }
  0x38   :  { %312 = vmatpush1.bf16.msra.mxu0 %v2028_v57  ;;  %v1393_v57 = vld [vmem:[%s2485_s3 + $0x80] sm:$0xff] }
  0x39   :  { %978 = vmatpush1.bf16.msra.mxu1 %v2029_v58  ;;  %313 = vmatprep.subr.bf16.mxu0 %v2036_v1  ;;  %v1394_v58 = vld [vmem:[%s2485_s3 + $0x88] sm:$0xff] }
  0x3a   :  { %979 = vmatprep.subr.bf16.mxu1 %v2036_v1 }
  0x3c   :  { %314 = vmatpush1.bf16.msra.mxu0 %v2030_v59  ;;  %v1870_v59 = vpack.c.bf16 %v1394_v58, %v1393_v57 }
  0x3d   :  { %980 = vmatpush1.bf16.msra.mxu1 %v2031_v60  ;;  %315 = vmatprep.subr.bf16.mxu0 %v2036_v1  ;;  %v1395_v60 = vld [vmem:[%s2485_s3 + $0x90] sm:$0xff] }
  0x3e   :  { %981 = vmatprep.subr.bf16.mxu1 %v2036_v1 }
  0x40   :  { %316 = vmatpush1.bf16.msra.mxu0 %v2032_v61  ;;  %v1396_v61 = vld [vmem:[%s2485_s3 + $0x98] sm:$0xff] }
  0x41   :  { %982 = vmatpush1.bf16.msra.mxu1 %v2033_v62  ;;  %317 = vmatprep.subr.bf16.mxu0 %v2036_v1  ;;  %v1873_v62 = vpack.c.bf16 %v1396_v61, %v1395_v60 }
  0x42   :  { %983 = vmatprep.subr.bf16.mxu1 %v2036_v1  ;;  %v345_v1 = vld [vmem:[%s2485_s3 + $0x8] sm:$0xff] }
  0x43   :  { %v1846_v7 = vpack.c.bf16 %v345_v1, %v344_v5  ;;  %v1400_v1 = vld [vmem:[%s2485_s3 + $0xb0] sm:$0xff] }
  0x44   :  { %318 = vmatpush1.bf16.msra.mxu0 %v259_v2  ;;  %v1876_v2 = vpack.c.bf16 %v1399_v0, %v1398_v63 }
  0x45   :  { %984 = vmatpush1.bf16.msra.mxu1 %v925_v3  ;;  %1845 = vmatprep.subr.bf16.mxu0 %v2038_v4 }
  0x46   :  { %1905 = vmatprep.subr.bf16.mxu1 %v2038_v4 }
  0x47   :  { %334 = vmatmul.mubr.bf16.vlgmr.msra.gmra.mrb[4].mxu0 %v2186_v43 }
  0x48   :  { %1000 = vmatmul.mubr.bf16.vlgmr.msra.gmra.mrb[4].mxu1 %v2186_v43  ;;  %1847 = vmatpush3.bf16.msra.mxu0 %v1846_v7 }
  0x49   :  { %1907 = vmatpush3.bf16.msra.mxu1 %v1846_v7  ;;  %1848 = vmatprep.subr.bf16.mxu0 %v2038_v4  ;;  %v1879_v7 = vpack.c.bf16 %v1401_v6, %v1400_v1 }
  0x4a   :  { %1908 = vmatprep.subr.bf16.mxu1 %v2038_v4  ;;  %1681 = vmatprep.mubr.msk.f32.mxu0 %vm2039_vm2, %v2040_v19 }
  0x4b   :  { %1773 = vmatprep.mubr.msk.f32.mxu1 %vm2039_vm2, %v2040_v19 }
  0x4c   :  { %1850 = vmatpush3.bf16.msra.mxu0 %v1849_v9 }
  0x4d   :  { %1910 = vmatpush3.bf16.msra.mxu1 %v1849_v9  ;;  %1851 = vmatprep.subr.bf16.mxu0 %v2038_v4  ;;  %v1403_v9 = vld [vmem:[%s2485_s3 + $0xc8] sm:$0xff] }
  0x4e   :  { %1911 = vmatprep.subr.bf16.mxu1 %v2038_v4  ;;  %v1882_v10 = vpack.c.bf16 %v1403_v9, %v1402_v8 }
  0x50   :  { %1853 = vmatpush3.bf16.msra.mxu0 %v1852_v12 }
  0x51   :  { %1913 = vmatpush3.bf16.msra.mxu1 %v1852_v12  ;;  %1854 = vmatprep.subr.bf16.mxu0 %v2038_v4  ;;  %v1405_v12 = vld [vmem:[%s2485_s3 + $0xd8] sm:$0xff] }
  0x52   :  { %1914 = vmatprep.subr.bf16.mxu1 %v2038_v4  ;;  %v1885_v13 = vpack.c.bf16 %v1405_v12, %v1404_v11 }
  0x54   :  { %1856 = vmatpush3.bf16.msra.mxu0 %v1855_v15 }
  0x55   :  { %1916 = vmatpush3.bf16.msra.mxu1 %v1855_v15  ;;  %1857 = vmatprep.subr.bf16.mxu0 %v2038_v4  ;;  %v1407_v15 = vld [vmem:[%s2485_s3 + $0xe8] sm:$0xff] }
  0x56   :  { %1917 = vmatprep.subr.bf16.mxu1 %v2038_v4  ;;  %v1888_v16 = vpack.c.bf16 %v1407_v15, %v1406_v14 }
  0x58   :  { %1859 = vmatpush3.bf16.msra.mxu0 %v1858_v18 }
  0x59   :  { %1919 = vmatpush3.bf16.msra.mxu1 %v1858_v18  ;;  %1860 = vmatprep.subr.bf16.mxu0 %v2038_v4  ;;  %v1410_v18 = vld [vmem:[%s2485_s3 + $0xf8] sm:$0xff] }
  0x5a   :  { %1920 = vmatprep.subr.bf16.mxu1 %v2038_v4 }
  0x8e   :  { %v83_v30 = vpop.permute.xlu0 %82 }
  0x92   :  { %v751_v31 = vpop.permute.xlu0 %750 }
  0xf6   :  { %v1545_v20 = vpop.f32.mrb[0].mxu0 }
  0xf7   :  { %v1611_v21 = vpop.f32.mrb[0].mxu1  ;;  %v1546_v22 = vpop.f32.mrb[1].mxu0 }
  0xf8   :  { %v1612_v23 = vpop.f32.mrb[1].mxu1  ;;  %v1547_v24 = vadd.f32 %v1546_v22, %v1545_v20  ;;  %v1548_v25 = vpop.f32.mrb[2].mxu0  ;;  %v1891_v20 = vpack.c.bf16 %v1410_v18, %v1409_v17 }
  0xf9   :  { %v1613_v26 = vadd.f32 %v1612_v23, %v1611_v21  ;;  %v1614_v27 = vpop.f32.mrb[2].mxu1  ;;  %v1549_v28 = vpop.f32.mrb[3].mxu0  ;;  %v1411_v23 = vld [vmem:[%s2485_s3 + $0x100] sm:$0xff] }
  0xfa   :  { %v1615_v29 = vpop.f32.mrb[3].mxu1  ;;  %v296_v32 = vadd.f32 %v1547_v24, %v83_v30  ;;  %v1412_v24 = vld [vmem:[%s2485_s3 + $0x108] sm:$0xff]  ;;  %v1414_v27 = vld [vmem:[%s2485_s3 + $0x118] sm:$0xff] }
  0xfb   :  { %v962_v33 = vadd.f32 %v1613_v26, %v751_v31  ;;  %v1894_v25 = vpack.c.bf16 %v1412_v24, %v1411_v23  ;;  %v1413_v26 = vld [vmem:[%s2485_s3 + $0x110] sm:$0xff]  ;;  %v1415_v29 = vld [vmem:[%s2485_s3 + $0x120] sm:$0xff]  ;;  %v1416_v30 = vld [vmem:[%s2485_s3 + $0x128] sm:$0xff] }
  0xfc   :  { %v1897_v28 = vpack.c.bf16 %v1414_v27, %v1413_v26  ;;  %v1900_v31 = vpack.c.bf16 %v1416_v30, %v1415_v29 }
 0x11a   :  { %v335_v34 = vpop.f32.mrb[4].mxu0 }
 0x11b   :  { %v1001_v35 = vpop.f32.mrb[4].mxu1  ;;  %v336_v36 = vadd.f32 %v335_v34, %v296_v32  ;;  %v337_v38 = vpop.f32.mrb[5].mxu0  ;;  %v1418_v32 = vld [vmem:[%s2485_s3 + $0x138] sm:$0xff] }
 0x11c   :  { %v1002_v37 = vadd.f32 %v1001_v35, %v962_v33  ;;  %v1003_v39 = vpop.f32.mrb[5].mxu1  ;;  %v338_v42 = vpop.f32.mrb[6].mxu0 }
 0x11d   :  { %v1004_v43 = vpop.f32.mrb[6].mxu1  ;;  %v341_v44 = vmax.f32 %v336_v36, 0.0  ;;  %v339_v46 = vpop.f32.mrb[7].mxu0  ;;  %v12_v36 = vstv %s2486_s6 }
 0x11e   :  { %v1007_v45 = vmax.f32 %v1002_v37, 0.0  ;;  %v1005_v47 = vpop.f32.mrb[7].mxu1  ;;  %13 = vst [vmem:[#allocation2] sm:$0x1] %v12_v36  ;;  %v343_v37 = vld [vmem:[%s2487_s4] sm:$0x1] }
 0x11f   :  { %v2317_v49 = vmin.f32 %v341_v44, 6.0  ;;  %v686_v46 = vld [vmem:[%s2488_s5] sm:$0x1] }
 0x120   :  { %v2319_v50 = vmin.f32 %v1007_v45, 6.0 }
 0x121   :  { %1682 = vmatmul.mubr.msk.f32.vlgmr.msra.gmra.mrb[8].mxu0 %vm354_vm3, %v2317_v49  ;;  %v440_v3 = vrot.slane %v2317_v49, 1  ;;  %v525_v21 = vrot.slane %v2317_v49, 2  ;;  %v610_v34 = vrot.slane %v2317_v49, 3  ;;  %v1348_v49 = vld [vmem:[%s2488_s5] sm:$0x1] }
 0x122   :  { %1774 = vmatmul.mubr.msk.f32.vlgmr.msra.gmra.mrb[8].mxu1 %vm354_vm3, %v2319_v50  ;;  %1862 = vmatpush3.bf16.msra.mxu0 %v1861_v48  ;;  %v1104_v5 = vrot.slane %v2319_v50, 1  ;;  %v1188_v22 = vrot.slane %v2319_v50, 2  ;;  %v1272_v35 = vrot.slane %v2319_v50, 3 }
 0x123   :  { %1922 = vmatpush3.bf16.msra.mxu1 %v1861_v48  ;;  %1863 = vmatprep.subr.bf16.mxu0 %v2038_v4 }
 0x124   :  { %1923 = vmatprep.subr.bf16.mxu1 %v2038_v4  ;;  %1704 = vmatprep.mubr.msk.f32.mxu0 %vm2039_vm2, %v2040_v19 }
 0x125   :  { %1796 = vmatprep.mubr.msk.f32.mxu1 %vm2039_vm2, %v2040_v19  ;;  %v692_v54 = vld [vmem:[#allocation2] sm:$0x1] }
 0x126   :  { %1865 = vmatpush3.bf16.msra.mxu0 %v1864_v53  ;;  %v1353_v57 = vld [vmem:[#allocation2] sm:$0x1] }
 0x127   :  { %1925 = vmatpush3.bf16.msra.mxu1 %v1864_v53  ;;  %1866 = vmatprep.subr.bf16.mxu0 %v2038_v4 }
 0x128   :  { %1926 = vmatprep.subr.bf16.mxu1 %v2038_v4 }
 0x12a   :  { %1868 = vmatpush3.bf16.msra.mxu0 %v1867_v56 }
 0x12b   :  { %1928 = vmatpush3.bf16.msra.mxu1 %v1867_v56  ;;  %1869 = vmatprep.subr.bf16.mxu0 %v2038_v4 }
 0x12c   :  { %1929 = vmatprep.subr.bf16.mxu1 %v2038_v4 }
 0x12e   :  { %1871 = vmatpush3.bf16.msra.mxu0 %v1870_v59 }
 0x12f   :  { %1931 = vmatpush3.bf16.msra.mxu1 %v1870_v59  ;;  %1872 = vmatprep.subr.bf16.mxu0 %v2038_v4 }
 0x130   :  { %1932 = vmatprep.subr.bf16.mxu1 %v2038_v4 }
 0x132   :  { %1874 = vmatpush3.bf16.msra.mxu0 %v1873_v62 }
 0x133   :  { %1934 = vmatpush3.bf16.msra.mxu1 %v1873_v62  ;;  %1875 = vmatprep.subr.bf16.mxu0 %v2038_v4 }
 0x134   :  { %1935 = vmatprep.subr.bf16.mxu1 %v2038_v4 }
 0x135   :  { %1705 = vmatmul.mubr.msk.f32.vlgmr.msra.gmra.mrb[8].mxu0 %vm354_vm3, %v440_v3 }
 0x136   :  { %1797 = vmatmul.mubr.msk.f32.vlgmr.msra.gmra.mrb[8].mxu1 %vm354_vm3, %v1104_v5  ;;  %1877 = vmatpush3.bf16.msra.mxu0 %v1876_v2 }
 0x137   :  { %1937 = vmatpush3.bf16.msra.mxu1 %v1876_v2  ;;  %1878 = vmatprep.subr.bf16.mxu0 %v2038_v4 }
 0x138   :  { %1938 = vmatprep.subr.bf16.mxu1 %v2038_v4  ;;  %1727 = vmatprep.mubr.msk.f32.mxu0 %vm2039_vm2, %v2040_v19 }
 0x139   :  { %1819 = vmatprep.mubr.msk.f32.mxu1 %vm2039_vm2, %v2040_v19 }
 0x13a   :  { %1880 = vmatpush3.bf16.msra.mxu0 %v1879_v7 }
 0x13b   :  { %1940 = vmatpush3.bf16.msra.mxu1 %v1879_v7  ;;  %1881 = vmatprep.subr.bf16.mxu0 %v2038_v4 }
 0x13c   :  { %1941 = vmatprep.subr.bf16.mxu1 %v2038_v4 }
 0x13e   :  { %1883 = vmatpush3.bf16.msra.mxu0 %v1882_v10 }
 0x13f   :  { %1943 = vmatpush3.bf16.msra.mxu1 %v1882_v10  ;;  %1884 = vmatprep.subr.bf16.mxu0 %v2038_v4 }
 0x140   :  { %1944 = vmatprep.subr.bf16.mxu1 %v2038_v4 }
 0x142   :  { %1886 = vmatpush3.bf16.msra.mxu0 %v1885_v13 }
 0x143   :  { %1946 = vmatpush3.bf16.msra.mxu1 %v1885_v13  ;;  %1887 = vmatprep.subr.bf16.mxu0 %v2038_v4 }
 0x144   :  { %1947 = vmatprep.subr.bf16.mxu1 %v2038_v4 }
 0x146   :  { %1889 = vmatpush3.bf16.msra.mxu0 %v1888_v16 }
 0x147   :  { %1949 = vmatpush3.bf16.msra.mxu1 %v1888_v16  ;;  %1890 = vmatprep.subr.bf16.mxu0 %v2038_v4 }
 0x148   :  { %1950 = vmatprep.subr.bf16.mxu1 %v2038_v4 }
 0x149   :  { %1728 = vmatmul.mubr.msk.f32.vlgmr.msra.gmra.mrb[8].mxu0 %vm354_vm3, %v525_v21 }
 0x14a   :  { %1820 = vmatmul.mubr.msk.f32.vlgmr.msra.gmra.mrb[8].mxu1 %vm354_vm3, %v1188_v22  ;;  %1892 = vmatpush3.bf16.msra.mxu0 %v1891_v20 }
 0x14b   :  { %1952 = vmatpush3.bf16.msra.mxu1 %v1891_v20  ;;  %1893 = vmatprep.subr.bf16.mxu0 %v2038_v4 }
 0x14c   :  { %1953 = vmatprep.subr.bf16.mxu1 %v2038_v4  ;;  %1750 = vmatprep.mubr.msk.f32.mxu0 %vm2039_vm2, %v2040_v19 }
 0x14d   :  { %1842 = vmatprep.mubr.msk.f32.mxu1 %vm2039_vm2, %v2040_v19  ;;  %v1417_v19 = vld [vmem:[%s2485_s3 + $0x130] sm:$0xff] }
 0x14e   :  { %1895 = vmatpush3.bf16.msra.mxu0 %v1894_v25  ;;  %v1903_v33 = vpack.c.bf16 %v1418_v32, %v1417_v19 }
 0x14f   :  { %1955 = vmatpush3.bf16.msra.mxu1 %v1894_v25  ;;  %1896 = vmatprep.subr.bf16.mxu0 %v2038_v4 }
 0x150   :  { %1956 = vmatprep.subr.bf16.mxu1 %v2038_v4 }
 0x152   :  { %1898 = vmatpush3.bf16.msra.mxu0 %v1897_v28 }
 0x153   :  { %1958 = vmatpush3.bf16.msra.mxu1 %v1897_v28  ;;  %1899 = vmatprep.subr.bf16.mxu0 %v2038_v4 }
 0x154   :  { %1959 = vmatprep.subr.bf16.mxu1 %v2038_v4 }
 0x156   :  { %1901 = vmatpush3.bf16.msra.mxu0 %v1900_v31 }
 0x157   :  { %1961 = vmatpush3.bf16.msra.mxu1 %v1900_v31  ;;  %1902 = vmatprep.subr.bf16.mxu0 %v2038_v4 }
 0x158   :  { %1962 = vmatprep.subr.bf16.mxu1 %v2038_v4  ;;  %v1009_v4 = vld [vmem:[%s2487_s4] sm:$0x1] }
 0x15a   :  { %1904 = vmatpush3.bf16.msra.mxu0 %v1903_v33 }
 0x15b   :  { %1964 = vmatpush3.bf16.msra.mxu1 %v1903_v33 }
 0x15d   :  { %1751 = vmatmul.mubr.msk.f32.vlgmr.msra.gmra.mrb[8].mxu0 %vm354_vm3, %v610_v34 }
 0x15e   :  { %1843 = vmatmul.mubr.msk.f32.vlgmr.msra.gmra.mrb[8].mxu1 %vm354_vm3, %v1272_v35 }
 0x230   :  { %v679_v38 = vpop.f32.mrb[8].mxu0 }
 0x231   :  { %v1341_v39 = vpop.f32.mrb[8].mxu1  ;;  %v1965_v40 = vadd.f32 %v679_v38, %v343_v37  ;;  %v1752_v42 = vpop.f32.mrb[9].mxu0 }
 0x232   :  { %v1966_v41 = vadd.f32 %v1341_v39, %v1009_v4  ;;  %v1844_v43 = vpop.f32.mrb[9].mxu1 }
 0x233   :  { %v684_v44 = vmax.f32 %v1965_v40, 0.0 }
 0x234   :  { %v1346_v45 = vmax.f32 %v1966_v41, 0.0 }
 0x235   :  { %v685_v47 = vmin.f32 %v684_v44, 6.0 }
 0x236   :  { %v1347_v48 = vmin.f32 %v1346_v45, 6.0 }
 0x237   :  { %v687_v50 = vmul.f32 %v686_v46, %v685_v47 }
 0x238   :  { %v1349_v52 = vmul.f32 %v1348_v49, %v1347_v48 }
 0x239   :  { %v689_v51 = vsel %vm688_vm4, %v687_v50, 0.0 }
 0x23a   :  { %690 = vadd.xlane.f32.xlu1 %v689_v51  ;;  %v1350_v53 = vsel %vm688_vm4, %v1349_v52, 0.0 }
 0x23e   :  { %1351 = vadd.xlane.f32.xlu1 %v1350_v53 }
 0x2c7   :  { %v691_v55 = vpop.xlane.xlu1 %690 }
 0x2c8   :  { %v693_v56 = vadd.f32 %v692_v54, %v691_v55 }
 0x2ca   :  { %695 = vst.msk [vmem:[%s2489_s7] sm:$0x1] %vm694_vm5, %v693_v56 }
 0x2cb   :  { %v1352_v58 = vpop.xlane.xlu1 %1351 }
 0x2cc   :  { %v1354_v59 = vadd.f32 %v1353_v57, %v1352_v58 }
 0x2ce   :  { %1355 = vst.msk [vmem:[%s2489_s7 + $0x1] sm:$0x1] %vm694_vm5, %v1354_v59 }

</bundles_post_ra>
